<compile_context>
chip_gen: v5e
topology: v5e:2x2
jax: 0.10.0
libtpu: 0.0.40
codegen_flags: <defaults>
</compile_context>

<pallas_src>
import functools
import math

import jax
import jax.numpy as jnp
from jax.experimental import pallas as pl
from jax.experimental.pallas import tpu as pltpu

EPS = 1e-6


# ------------------------------- helpers -----------------------------------

def _row_tile(m, cap=256):
    """Largest row tile <= cap that divides m (m itself if already small)."""
    if m <= cap:
        return m
    for t in (256, 128, 64, 32, 16, 8):
        if m % t == 0:
            return t
    return m


def _ln(x, alpha, bias, eps):
    """mc.LayerNormalization: alpha*(x-mean)/(std+eps)+bias, unbiased std."""
    n = x.shape[-1]
    mean = jnp.mean(x, axis=-1, keepdims=True)
    diff = x - mean
    var = jnp.sum(diff * diff, axis=-1, keepdims=True) / (n - 1)  # torch ddof=1
    return alpha * diff / (jnp.sqrt(var) + eps) + bias


# ------------------------------- kernels ------------------------------------

def _ln_matmul_kernel(a_ref, b_ref, x_ref, w_ref, bias_ref, o_ref, *, eps):
    """y = LN(x) @ W + b   (LayerNorm fused as matmul prologue)."""
    x = x_ref[...].astype(jnp.float32)
    h = _ln(x, a_ref[...], b_ref[...], eps)
    y = jnp.dot(h, w_ref[...].astype(jnp.float32),
                preferred_element_type=jnp.float32) + bias_ref[...]
    o_ref[...] = y.astype(o_ref.dtype)


def _matmul_kernel(x_ref, w_ref, bias_ref, o_ref):
    """y = x @ W + b."""
    y = jnp.dot(x_ref[...].astype(jnp.float32), w_ref[...].astype(jnp.float32),
                preferred_element_type=jnp.float32) + bias_ref[...]
    o_ref[...] = y.astype(o_ref.dtype)


def _ln_ffn_kernel(a_ref, b_ref, x_ref, w1_ref, b1_ref, w2_ref, b2_ref, o_ref,
                   *, eps):
    """Whole FFN sub-layer in one kernel: y = x + W2(relu(W1(LN(x))))."""
    x = x_ref[...].astype(jnp.float32)
    h = _ln(x, a_ref[...], b_ref[...], eps)
    u = jnp.maximum(
        jnp.dot(h, w1_ref[...], preferred_element_type=jnp.float32) + b1_ref[...],
        0.0)
    y = jnp.dot(u, w2_ref[...], preferred_element_type=jnp.float32) + b2_ref[...]
    o_ref[...] = (x + y).astype(o_ref.dtype)


def _layernorm_kernel(a_ref, b_ref, x_ref, o_ref, *, eps):
    x = x_ref[...].astype(jnp.float32)
    o_ref[...] = _ln(x, a_ref[...], b_ref[...], eps).astype(o_ref.dtype)


def _attention_kernel(q_ref, k_ref, v_ref, m_ref, res_ref, wo_ref, bo_ref, o_ref,
                      *, scale):
    """All heads of one batch: softmax(QK^T*scale, mask) V, out-proj, +residual.

    Output is written lane-dense as [Tq, D = H*dk] (not per-head [Tq, dk]).
    """
    q = q_ref[0].astype(jnp.float32)          # [H, Tq, dk]
    k = k_ref[0].astype(jnp.float32)          # [H, Tk, dk]
    v = v_ref[0].astype(jnp.float32)          # [H, Tk, dk]
    mask = m_ref[0]                           # [Tq, Tk], 1 = keep, 0 = masked

    s = jax.lax.dot_general(q, k, (((2,), (2,)), ((0,), (0,))),
                            preferred_element_type=jnp.float32) * scale   # [H,Tq,Tk]
    s = jnp.where(mask[None, :, :] == 0, -1e9, s)   # masked_fill(mask==0, -1e9)
    s = s - jnp.max(s, axis=-1, keepdims=True)
    p = jnp.exp(s)
    p = p * pl.reciprocal(jnp.sum(p, axis=-1, keepdims=True), approx=True)
    o = jax.lax.dot_general(p, v, (((2,), (1,)), ((0,), (0,))),
                            preferred_element_type=jnp.float32)           # [H,Tq,dk]
    # fused output projection: sum_h o[h] @ Wo[h]  (Wo stored as [H, dk, D])
    proj = jax.lax.dot_general(o, wo_ref[...].astype(jnp.float32),
                               (((2,), (1,)), ((0,), (0,))),
                               preferred_element_type=jnp.float32)        # [H,Tq,D]
    y = jnp.sum(proj, axis=0) + bo_ref[...] + res_ref[0].astype(jnp.float32)
    o_ref[0] = y.astype(o_ref.dtype)


# ----------------------------- pallas wrappers -------------------------------

def ln_linear(x2d, alpha, lbias, w, b, *, eps=EPS):
    M, D = x2d.shape
    N = w.shape[1]
    tm = _row_tile(M)
    return pl.pallas_call(
        functools.partial(_ln_matmul_kernel, eps=eps),
        out_shape=jax.ShapeDtypeStruct((M, N), x2d.dtype),
        grid=(M // tm,),
        in_specs=[pl.BlockSpec((1, 1), lambda i: (0, 0)),
                  pl.BlockSpec((1, 1), lambda i: (0, 0)),
                  pl.BlockSpec((tm, D), lambda i: (i, 0)),
                  pl.BlockSpec((D, N), lambda i: (0, 0)),
                  pl.BlockSpec((1, N), lambda i: (0, 0))],
        out_specs=pl.BlockSpec((tm, N), lambda i: (i, 0)),
        compiler_params=pltpu.CompilerParams(dimension_semantics=("parallel",)),
    )(alpha, lbias, x2d, w, b.reshape(1, N))


def linear(x2d, w, b):
    M, K = x2d.shape
    N = w.shape[1]
    tm = _row_tile(M)
    return pl.pallas_call(
        _matmul_kernel,
        out_shape=jax.ShapeDtypeStruct((M, N), x2d.dtype),
        grid=(M // tm,),
        in_specs=[pl.BlockSpec((tm, K), lambda i: (i, 0)),
                  pl.BlockSpec((K, N), lambda i: (0, 0)),
                  pl.BlockSpec((1, N), lambda i: (0, 0))],
        out_specs=pl.BlockSpec((tm, N), lambda i: (i, 0)),
        compiler_params=pltpu.CompilerParams(dimension_semantics=("parallel",)),
    )(x2d, w, b.reshape(1, N))


def ln_ffn(x2d, alpha, lbias, w1, b1, w2, b2, *, eps=EPS):
    M, D = x2d.shape
    F = w1.shape[1]
    tm = _row_tile(M)
    return pl.pallas_call(
        functools.partial(_ln_ffn_kernel, eps=eps),
        out_shape=jax.ShapeDtypeStruct((M, D), x2d.dtype),
        grid=(M // tm,),
        in_specs=[pl.BlockSpec((1, 1), lambda i: (0, 0)),
                  pl.BlockSpec((1, 1), lambda i: (0, 0)),
                  pl.BlockSpec((tm, D), lambda i: (i, 0)),
                  pl.BlockSpec((D, F), lambda i: (0, 0)),
                  pl.BlockSpec((1, F), lambda i: (0, 0)),
                  pl.BlockSpec((F, D), lambda i: (0, 0)),
                  pl.BlockSpec((1, D), lambda i: (0, 0))],
        out_specs=pl.BlockSpec((tm, D), lambda i: (i, 0)),
        compiler_params=pltpu.CompilerParams(dimension_semantics=("parallel",)),
    )(alpha, lbias, x2d, w1, b1.reshape(1, F), w2, b2.reshape(1, D))


def layer_norm(x2d, alpha, bias, *, eps=EPS):
    M, D = x2d.shape
    tm = _row_tile(M)
    return pl.pallas_call(
        functools.partial(_layernorm_kernel, eps=eps),
        out_shape=jax.ShapeDtypeStruct((M, D), x2d.dtype),
        grid=(M // tm,),
        in_specs=[pl.BlockSpec((1, 1), lambda i: (0, 0)),
                  pl.BlockSpec((1, 1), lambda i: (0, 0)),
                  pl.BlockSpec((tm, D), lambda i: (i, 0))],
        out_specs=pl.BlockSpec((tm, D), lambda i: (i, 0)),
        compiler_params=pltpu.CompilerParams(dimension_semantics=("parallel",)),
    )(alpha, bias, x2d)


def fused_attention(q, k, v, mask, x_res, wo, bo, *, scale):
    # q: [B,H,Tq,dk]  k,v: [B,H,Tk,dk]  mask: [B,Tq,Tk]  x_res: [B,Tq,D]
    # wo: [H,dk,D]    bo: [D]           returns [B,Tq,D] (attn + out-proj + residual)
    B, H, Tq, dk = q.shape
    Tk = k.shape[2]
    D = H * dk
    return pl.pallas_call(
        functools.partial(_attention_kernel, scale=scale),
        out_shape=jax.ShapeDtypeStruct((B, Tq, D), x_res.dtype),
        grid=(B,),
        in_specs=[pl.BlockSpec((1, H, Tq, dk), lambda b: (b, 0, 0, 0)),
                  pl.BlockSpec((1, H, Tk, dk), lambda b: (b, 0, 0, 0)),
                  pl.BlockSpec((1, H, Tk, dk), lambda b: (b, 0, 0, 0)),
                  pl.BlockSpec((1, Tq, Tk), lambda b: (b, 0, 0)),
                  pl.BlockSpec((1, Tq, D), lambda b: (b, 0, 0)),
                  pl.BlockSpec((H, dk, D), lambda b: (0, 0, 0)),
                  pl.BlockSpec((1, D), lambda b: (0, 0))],
        out_specs=pl.BlockSpec((1, Tq, D), lambda b: (b, 0, 0)),
        compiler_params=pltpu.CompilerParams(dimension_semantics=("parallel",)),
    )(q, k, v, mask, x_res, wo, bo.reshape(1, D))


# ----------------------------- model wrappers -------------------------------

def decoder_block(x, enc, src_mask, tgt_mask, p, n_heads):
    B, T, D = x.shape
    S = enc.shape[1]
    dk = D // n_heads
    scale = 1.0 / math.sqrt(dk)
    M = B * T

    # ---- self-attention sub-layer: LN + fused QKV proj, then fused attention
    sa = p["self_attn"]
    qkv = ln_linear(x.reshape(M, D), p["ln1_a"], p["ln1_b"], sa["wqkv"], sa["bqkv"])
    qkv = qkv.reshape(B, T, 3, n_heads, dk).transpose(2, 0, 3, 1, 4)   # [3,B,H,T,dk]
    tgt_m = jnp.broadcast_to(tgt_mask, (B, 1, T, T)).reshape(B, T, T).astype(jnp.float32)
    x = fused_attention(qkv[0], qkv[1], qkv[2], tgt_m, x, sa["wo"], sa["bo"],
                        scale=scale)

    # ---- cross-attention sub-layer: Q from LN(x), K/V from encoder output
    ca = p["cross_attn"]
    q = ln_linear(x.reshape(M, D), p["ln2_a"], p["ln2_b"], ca["wq"], ca["bq"])
    q = q.reshape(B, T, n_heads, dk).transpose(0, 2, 1, 3)              # [B,H,T,dk]
    kv = linear(enc.reshape(B * S, D), ca["wkv"], ca["bkv"])
    kv = kv.reshape(B, S, 2, n_heads, dk).transpose(2, 0, 3, 1, 4)      # [2,B,H,S,dk]
    src_m = jnp.broadcast_to(src_mask, (B, 1, T, S)).reshape(B, T, S).astype(jnp.float32)
    x = fused_attention(q, kv[0], kv[1], src_m, x, ca["wo"], ca["bo"], scale=scale)

    # ---- feed-forward sub-layer: LN + W1 + relu + W2 + residual in ONE kernel
    # TODO(synk): dropout omitted (identity at inference)
    y = ln_ffn(x.reshape(M, D), p["ln3_a"], p["ln3_b"],
               p["w1"], p["b1"], p["w2"], p["b2"])
    return y.reshape(B, T, D)


def decoder_forward(x, encoder_output, src_mask, target_mask, params, n_heads):
    for p in params["layers"]:
        x = decoder_block(x, encoder_output, src_mask, target_mask, p, n_heads)
    B, T, D = x.shape
    out = layer_norm(x.reshape(B * T, D), params["norm_a"], params["norm_b"])
    return out.reshape(B, T, D)


# ----------------------------- parameter init -------------------------------

def init_params(key, n_layers, d_model, d_ff, n_heads):
    dk = d_model // n_heads

    def dense(k, fi, fo):
        kw, kb = jax.random.split(k)
        w = jax.random.normal(kw, (fi, fo), jnp.float32) / math.sqrt(fi)
        b = jax.random.normal(kb, (fo,), jnp.float32) * 0.01
        return w, b

    def attn(k, fused_qkv):
        ks = jax.random.split(k, 4)
        wq, bq = dense(ks[0], d_model, d_model)
        wk, bk = dense(ks[1], d_model, d_model)
        wv, bv = dense(ks[2], d_model, d_model)
        wo, bo = dense(ks[3], d_model, d_model)
        p = dict(wo=wo.reshape(n_heads, dk, d_model), bo=bo)
        if fused_qkv:
            p.update(wqkv=jnp.concatenate([wq, wk, wv], axis=1),
                     bqkv=jnp.concatenate([bq, bk, bv], axis=0))
        else:
            p.update(wq=wq, bq=bq,
                     wkv=jnp.concatenate([wk, wv], axis=1),
                     bkv=jnp.concatenate([bk, bv], axis=0))
        return p

    one = jnp.ones((1, 1), jnp.float32)
    zero = jnp.zeros((1, 1), jnp.float32)
    layers = []
    for i in range(n_layers):
        k = jax.random.fold_in(key, i)
        k_sa, k_ca, k_f1, k_f2 = jax.random.split(k, 4)
        w1, b1 = dense(k_f1, d_model, d_ff)
        w2, b2 = dense(k_f2, d_ff, d_model)
        layers.append(dict(
            self_attn=attn(k_sa, True),
            cross_attn=attn(k_ca, False),
            w1=w1, b1=b1, w2=w2, b2=b2,
            ln1_a=one, ln1_b=zero,
            ln2_a=one, ln2_b=zero,
            ln3_a=one, ln3_b=zero,
        ))
    return dict(layers=layers, norm_a=one, norm_b=zero)


# --------------------------------- main --------------------------------------

if __name__ == "__main__":
    B, T_TGT, T_SRC, D_MODEL, N_HEADS, D_FF, N_LAYERS = 2, 8, 8, 32, 4, 64, 2

    key = jax.random.PRNGKey(0)
    k_x, k_enc, k_p = jax.random.split(key, 3)

    x = jax.random.normal(k_x, (B, T_TGT, D_MODEL), jnp.float32)
    encoder_output = jax.random.normal(k_enc, (B, T_SRC, D_MODEL), jnp.float32)
    # src_mask: (B,1,1,T_src), 1 = keep; tgt_mask: causal (B,1,T_tgt,T_tgt)
    src_mask = jnp.ones((B, 1, 1, T_SRC), jnp.float32)
    causal = jnp.tril(jnp.ones((T_TGT, T_TGT), jnp.float32))
    tgt_mask = jnp.broadcast_to(causal, (B, 1, T_TGT, T_TGT))

    params = init_params(k_p, N_LAYERS, D_MODEL, D_FF, N_HEADS)

    fwd = jax.jit(decoder_forward, static_argnums=(5,))
    out = fwd(x, encoder_output, src_mask, tgt_mask, params, N_HEADS)
    out = jax.block_until_ready(out)

    assert out.shape == (B, T_TGT, D_MODEL) and out.dtype == jnp.float32
    assert bool(jnp.all(jnp.isfinite(out)))
    print("KERNEL_OK")
</pallas_src>

<mosaic_0001>
module attributes {stable_mosaic.version = 11 : i64} {
  func.func @_ln_matmul_kernel(%arg0: i32, %arg1: memref<1x1xf32, #tpu.memory_space<vmem>>, %arg2: memref<1x1xf32, #tpu.memory_space<vmem>>, %arg3: memref<16x32xf32, #tpu.memory_space<vmem>>, %arg4: memref<32x96xf32, #tpu.memory_space<vmem>>, %arg5: memref<1x96xf32, #tpu.memory_space<vmem>>, %arg6: memref<16x96xf32, #tpu.memory_space<vmem>>) attributes {dimension_semantics = [#tpu.dimension_semantics<parallel>], iteration_bounds = array<i64: 1>, scalar_prefetch = 0 : i64, scratch_operands = 0 : i64, tpu.core_type = #tpu.core_type<tc>, window_params = [{pipeline_mode = #tpu.pipeline_mode<synchronous>, transform_indices = @transform_0, window_bounds = array<i64: 1, 1>}, {pipeline_mode = #tpu.pipeline_mode<synchronous>, transform_indices = @transform_1, window_bounds = array<i64: 1, 1>}, {transform_indices = @transform_2, window_bounds = array<i64: 16, 32>}, {pipeline_mode = #tpu.pipeline_mode<synchronous>, transform_indices = @transform_3, window_bounds = array<i64: 32, 96>}, {pipeline_mode = #tpu.pipeline_mode<synchronous>, transform_indices = @transform_4, window_bounds = array<i64: 1, 96>}, {transform_indices = @transform_5, window_bounds = array<i64: 16, 96>}]} {
    %c0 = arith.constant 0 : index
    %c0_0 = arith.constant 0 : index
    %0 = vector.load %arg3[%c0, %c0_0] : memref<16x32xf32, #tpu.memory_space<vmem>>, vector<16x32xf32>
    %c0_1 = arith.constant 0 : index
    %c0_2 = arith.constant 0 : index
    %1 = vector.load %arg1[%c0_1, %c0_2] : memref<1x1xf32, #tpu.memory_space<vmem>>, vector<1x1xf32>
    %c0_3 = arith.constant 0 : index
    %c0_4 = arith.constant 0 : index
    %2 = vector.load %arg2[%c0_3, %c0_4] : memref<1x1xf32, #tpu.memory_space<vmem>>, vector<1x1xf32>
    %cst = arith.constant dense<0.000000e+00> : vector<16xf32>
    %3 = vector.multi_reduction <add>, %0, %cst [1] : vector<16x32xf32> to vector<16xf32>
    %4 = vector.shape_cast %3 : vector<16xf32> to vector<16x1xf32>
    %cst_5 = arith.constant 3.200000e+01 : f32
    %5 = vector.broadcast %cst_5 : f32 to vector<16x1xf32>
    %6 = arith.divf %4, %5 : vector<16x1xf32>
    %7 = vector.broadcast %6 : vector<16x1xf32> to vector<16x32xf32>
    %8 = arith.subf %0, %7 : vector<16x32xf32>
    %9 = arith.mulf %8, %8 : vector<16x32xf32>
    %cst_6 = arith.constant dense<0.000000e+00> : vector<16xf32>
    %10 = vector.multi_reduction <add>, %9, %cst_6 [1] : vector<16x32xf32> to vector<16xf32>
    %11 = vector.shape_cast %10 : vector<16xf32> to vector<16x1xf32>
    %cst_7 = arith.constant 3.100000e+01 : f32
    %12 = vector.broadcast %cst_7 : f32 to vector<16x1xf32>
    %13 = arith.divf %11, %12 : vector<16x1xf32>
    %14 = vector.broadcast %1 : vector<1x1xf32> to vector<16x32xf32>
    %15 = arith.mulf %14, %8 : vector<16x32xf32>
    %16 = math.sqrt %13 : vector<16x1xf32>
    %cst_8 = arith.constant 9.99999997E-7 : f32
    %17 = vector.broadcast %cst_8 : f32 to vector<16x1xf32>
    %18 = arith.addf %16, %17 : vector<16x1xf32>
    %19 = vector.broadcast %18 : vector<16x1xf32> to vector<16x32xf32>
    %20 = arith.divf %15, %19 : vector<16x32xf32>
    %21 = vector.broadcast %2 : vector<1x1xf32> to vector<16x32xf32>
    %22 = arith.addf %20, %21 : vector<16x32xf32>
    %c0_9 = arith.constant 0 : index
    %c0_10 = arith.constant 0 : index
    %23 = vector.load %arg4[%c0_9, %c0_10] : memref<32x96xf32, #tpu.memory_space<vmem>>, vector<32x96xf32>
    %cst_11 = arith.constant dense<0.000000e+00> : vector<16x96xf32>
    %24 = tpu.matmul %22, %23, %cst_11 {dimension_numbers = #tpu.dot_dimension_numbers<[1], [0], [0], [1], [0, 0, 1, 1], [], []>} : vector<16x32xf32>, vector<32x96xf32>, vector<16x96xf32> -> vector<16x96xf32>
    %c0_12 = arith.constant 0 : index
    %c0_13 = arith.constant 0 : index
    %25 = vector.load %arg5[%c0_12, %c0_13] : memref<1x96xf32, #tpu.memory_space<vmem>>, vector<1x96xf32>
    %26 = vector.broadcast %25 : vector<1x96xf32> to vector<16x96xf32>
    %27 = arith.addf %24, %26 : vector<16x96xf32>
    %c0_14 = arith.constant 0 : index
    %c0_15 = arith.constant 0 : index
    %28 = vector.load %arg6[%c0_14, %c0_15] : memref<16x96xf32, #tpu.memory_space<vmem>>, vector<16x96xf32>
    tpu.vector_store %arg6[%c0_14, %c0_15], %27 {strides = array<i32>} : memref<16x96xf32, #tpu.memory_space<vmem>>, vector<16x96xf32>,
    return
  }
  func.func @transform_0(%arg0: i32) -> (i32, i32) {
    %c0_i32 = arith.constant 0 : i32
    %c0_i32_0 = arith.constant 0 : i32
    %c0_i32_1 = arith.constant 0 : i32
    return %c0_i32, %c0_i32_0 : i32, i32
  }
  func.func @transform_1(%arg0: i32) -> (i32, i32) {
    %c0_i32 = arith.constant 0 : i32
    %c0_i32_0 = arith.constant 0 : i32
    %c0_i32_1 = arith.constant 0 : i32
    return %c0_i32, %c0_i32_0 : i32, i32
  }
  func.func @transform_2(%arg0: i32) -> (i32, i32) {
    %c0_i32 = arith.constant 0 : i32
    %c0_i32_0 = arith.constant 0 : i32
    return %arg0, %c0_i32 : i32, i32
  }
  func.func @transform_3(%arg0: i32) -> (i32, i32) {
    %c0_i32 = arith.constant 0 : i32
    %c0_i32_0 = arith.constant 0 : i32
    %c0_i32_1 = arith.constant 0 : i32
    return %c0_i32, %c0_i32_0 : i32, i32
  }
  func.func @transform_4(%arg0: i32) -> (i32, i32) {
    %c0_i32 = arith.constant 0 : i32
    %c0_i32_0 = arith.constant 0 : i32
    %c0_i32_1 = arith.constant 0 : i32
    return %c0_i32, %c0_i32_0 : i32, i32
  }
  func.func @transform_5(%arg0: i32) -> (i32, i32) {
    %c0_i32 = arith.constant 0 : i32
    %c0_i32_0 = arith.constant 0 : i32
    return %arg0, %c0_i32 : i32, i32
  }
}

module attributes {stable_mosaic.version = 11 : i64} {
  func.func @_attention_kernel(%arg0: i32, %arg1: memref<1x4x8x8xf32, #tpu.memory_space<vmem>>, %arg2: memref<1x4x8x8xf32, #tpu.memory_space<vmem>>, %arg3: memref<1x4x8x8xf32, #tpu.memory_space<vmem>>, %arg4: memref<1x8x8xf32, #tpu.memory_space<vmem>>, %arg5: memref<1x8x32xf32, #tpu.memory_space<vmem>>, %arg6: memref<4x8x32xf32, #tpu.memory_space<vmem>>, %arg7: memref<1x32xf32, #tpu.memory_space<vmem>>, %arg8: memref<1x8x32xf32, #tpu.memory_space<vmem>>) attributes {dimension_semantics = [#tpu.dimension_semantics<parallel>], iteration_bounds = array<i64: 2>, scalar_prefetch = 0 : i64, scratch_operands = 0 : i64, tpu.core_type = #tpu.core_type<tc>, window_params = [{transform_indices = @transform_0, window_bounds = array<i64: 1, 4, 8, 8>}, {transform_indices = @transform_1, window_bounds = array<i64: 1, 4, 8, 8>}, {transform_indices = @transform_2, window_bounds = array<i64: 1, 4, 8, 8>}, {transform_indices = @transform_3, window_bounds = array<i64: 1, 8, 8>}, {transform_indices = @transform_4, window_bounds = array<i64: 1, 8, 32>}, {pipeline_mode = #tpu.pipeline_mode<synchronous>, transform_indices = @transform_5, window_bounds = array<i64: 4, 8, 32>}, {pipeline_mode = #tpu.pipeline_mode<synchronous>, transform_indices = @transform_6, window_bounds = array<i64: 1, 32>}, {transform_indices = @transform_7, window_bounds = array<i64: 1, 8, 32>}]} {
    %c0 = arith.constant 0 : index
    %c0_0 = arith.constant 0 : index
    %c0_1 = arith.constant 0 : index
    %c0_2 = arith.constant 0 : index
    %0 = vector.load %arg1[%c0, %c0_0, %c0_1, %c0_2] : memref<1x4x8x8xf32, #tpu.memory_space<vmem>>, vector<1x4x8x8xf32>
    %1 = vector.shape_cast %0 : vector<1x4x8x8xf32> to vector<4x8x8xf32>
    %c0_3 = arith.constant 0 : index
    %c0_4 = arith.constant 0 : index
    %c0_5 = arith.constant 0 : index
    %c0_6 = arith.constant 0 : index
    %2 = vector.load %arg2[%c0_3, %c0_4, %c0_5, %c0_6] : memref<1x4x8x8xf32, #tpu.memory_space<vmem>>, vector<1x4x8x8xf32>
    %3 = vector.shape_cast %2 : vector<1x4x8x8xf32> to vector<4x8x8xf32>
    %c0_7 = arith.constant 0 : index
    %c0_8 = arith.constant 0 : index
    %c0_9 = arith.constant 0 : index
    %c0_10 = arith.constant 0 : index
    %4 = vector.load %arg3[%c0_7, %c0_8, %c0_9, %c0_10] : memref<1x4x8x8xf32, #tpu.memory_space<vmem>>, vector<1x4x8x8xf32>
    %5 = vector.shape_cast %4 : vector<1x4x8x8xf32> to vector<4x8x8xf32>
    %c0_11 = arith.constant 0 : index
    %c0_12 = arith.constant 0 : index
    %c0_13 = arith.constant 0 : index
    %6 = vector.load %arg4[%c0_11, %c0_12, %c0_13] : memref<1x8x8xf32, #tpu.memory_space<vmem>>, vector<1x8x8xf32>
    %7 = vector.shape_cast %6 : vector<1x8x8xf32> to vector<8x8xf32>
    %cst = arith.constant dense<0.000000e+00> : vector<4x8x8xf32>
    %8 = tpu.matmul %1, %3, %cst {dimension_numbers = #tpu.dot_dimension_numbers<[2], [2], [1], [1], [0, 0, 0, 1, 1, 1], [0], [0]>} : vector<4x8x8xf32>, vector<4x8x8xf32>, vector<4x8x8xf32> -> vector<4x8x8xf32>
    %cst_14 = arith.constant 0.353553385 : f32
    %9 = vector.broadcast %cst_14 : f32 to vector<4x8x8xf32>
    %10 = arith.mulf %8, %9 : vector<4x8x8xf32>
    %11 = vector.shape_cast %7 : vector<8x8xf32> to vector<1x8x8xf32>
    %cst_15 = arith.constant 0.000000e+00 : f32
    %12 = vector.broadcast %cst_15 : f32 to vector<1x8x8xf32>
    %13 = arith.cmpf oeq, %11, %12 : vector<1x8x8xf32>
    %cst_16 = arith.constant -1.000000e+09 : f32
    %14 = vector.shape_cast %13 : vector<1x8x8xi1> to vector<1x8x8xi1>
    %15 = vector.broadcast %14 : vector<1x8x8xi1> to vector<4x8x8xi1>
    %16 = vector.broadcast %cst_16 : f32 to vector<4x8x8xf32>
    %17 = arith.select %15, %16, %10 : vector<4x8x8xi1>, vector<4x8x8xf32>
    %cst_17 = arith.constant dense<0xFF800000> : vector<4x8xf32>
    %18 = vector.multi_reduction <maximumf>, %17, %cst_17 [2] : vector<4x8x8xf32> to vector<4x8xf32>
    %19 = vector.shape_cast %18 : vector<4x8xf32> to vector<4x8x1xf32>
    %20 = vector.broadcast %19 : vector<4x8x1xf32> to vector<4x8x8xf32>
    %21 = arith.subf %17, %20 : vector<4x8x8xf32>
    %22 = math.exp %21 : vector<4x8x8xf32>
    %cst_18 = arith.constant dense<0.000000e+00> : vector<4x8xf32>
    %23 = vector.multi_reduction <add>, %22, %cst_18 [2] : vector<4x8x8xf32> to vector<4x8xf32>
    %24 = vector.shape_cast %23 : vector<4x8xf32> to vector<4x8x1xf32>
    %25 = tpu.reciprocal %24 {approx = true} : vector<4x8x1xf32> -> vector<4x8x1xf32>
    %26 = vector.broadcast %25 : vector<4x8x1xf32> to vector<4x8x8xf32>
    %27 = arith.mulf %22, %26 : vector<4x8x8xf32>
    %cst_19 = arith.constant dense<0.000000e+00> : vector<4x8x8xf32>
    %28 = tpu.matmul %27, %5, %cst_19 {dimension_numbers = #tpu.dot_dimension_numbers<[2], [1], [1], [2], [0, 0, 0, 1, 1, 2], [0], [0]>} : vector<4x8x8xf32>, vector<4x8x8xf32>, vector<4x8x8xf32> -> vector<4x8x8xf32>
    %c0_20 = arith.constant 0 : index
    %c0_21 = arith.constant 0 : index
    %c0_22 = arith.constant 0 : index
    %29 = vector.load %arg6[%c0_20, %c0_21, %c0_22] : memref<4x8x32xf32, #tpu.memory_space<vmem>>, vector<4x8x32xf32>
    %cst_23 = arith.constant dense<0.000000e+00> : vector<4x8x32xf32>
    %30 = tpu.matmul %28, %29, %cst_23 {dimension_numbers = #tpu.dot_dimension_numbers<[2], [1], [1], [2], [0, 0, 0, 1, 1, 2], [0], [0]>} : vector<4x8x8xf32>, vector<4x8x32xf32>, vector<4x8x32xf32> -> vector<4x8x32xf32>
    %cst_24 = arith.constant dense<0.000000e+00> : vector<8x32xf32>
    %31 = vector.multi_reduction <add>, %30, %cst_24 [0] : vector<4x8x32xf32> to vector<8x32xf32>
    %c0_25 = arith.constant 0 : index
    %c0_26 = arith.constant 0 : index
    %32 = vector.load %arg7[%c0_25, %c0_26] : memref<1x32xf32, #tpu.memory_space<vmem>>, vector<1x32xf32>
    %33 = vector.broadcast %32 : vector<1x32xf32> to vector<8x32xf32>
    %34 = arith.addf %31, %33 : vector<8x32xf32>
    %c0_27 = arith.constant 0 : index
    %c0_28 = arith.constant 0 : index
    %c0_29 = arith.constant 0 : index
    %35 = vector.load %arg5[%c0_27, %c0_28, %c0_29] : memref<1x8x32xf32, #tpu.memory_space<vmem>>, vector<1x8x32xf32>
    %36 = vector.shape_cast %35 : vector<1x8x32xf32> to vector<8x32xf32>
    %37 = arith.addf %34, %36 : vector<8x32xf32>
    %c0_30 = arith.constant 0 : index
    %c0_31 = arith.constant 0 : index
    %c0_32 = arith.constant 0 : index
    %38 = vector.load %arg8[%c0_30, %c0_31, %c0_32] : memref<1x8x32xf32, #tpu.memory_space<vmem>>, vector<1x8x32xf32>
    %39 = vector.shape_cast %38 : vector<1x8x32xf32> to vector<8x32xf32>
    %40 = vector.shape_cast %37 : vector<8x32xf32> to vector<1x8x32xf32>
    tpu.vector_store %arg8[%c0_30, %c0_31, %c0_32], %40 {strides = array<i32>} : memref<1x8x32xf32, #tpu.memory_space<vmem>>, vector<1x8x32xf32>,
    return
  }
  func.func @transform_0(%arg0: i32) -> (i32, i32, i32, i32) {
    %c0_i32 = arith.constant 0 : i32
    %c0_i32_0 = arith.constant 0 : i32
    %c0_i32_1 = arith.constant 0 : i32
    %c0_i32_2 = arith.constant 0 : i32
    return %arg0, %c0_i32, %c0_i32_0, %c0_i32_1 : i32, i32, i32, i32
  }
  func.func @transform_1(%arg0: i32) -> (i32, i32, i32, i32) {
    %c0_i32 = arith.constant 0 : i32
    %c0_i32_0 = arith.constant 0 : i32
    %c0_i32_1 = arith.constant 0 : i32
    %c0_i32_2 = arith.constant 0 : i32
    return %arg0, %c0_i32, %c0_i32_0, %c0_i32_1 : i32, i32, i32, i32
  }
  func.func @transform_2(%arg0: i32) -> (i32, i32, i32, i32) {
    %c0_i32 = arith.constant 0 : i32
    %c0_i32_0 = arith.constant 0 : i32
    %c0_i32_1 = arith.constant 0 : i32
    %c0_i32_2 = arith.constant 0 : i32
    return %arg0, %c0_i32, %c0_i32_0, %c0_i32_1 : i32, i32, i32, i32
  }
  func.func @transform_3(%arg0: i32) -> (i32, i32, i32) {
    %c0_i32 = arith.constant 0 : i32
    %c0_i32_0 = arith.constant 0 : i32
    %c0_i32_1 = arith.constant 0 : i32
    return %arg0, %c0_i32, %c0_i32_0 : i32, i32, i32
  }
  func.func @transform_4(%arg0: i32) -> (i32, i32, i32) {
    %c0_i32 = arith.constant 0 : i32
    %c0_i32_0 = arith.constant 0 : i32
    %c0_i32_1 = arith.constant 0 : i32
    return %arg0, %c0_i32, %c0_i32_0 : i32, i32, i32
  }
  func.func @transform_5(%arg0: i32) -> (i32, i32, i32) {
    %c0_i32 = arith.constant 0 : i32
    %c0_i32_0 = arith.constant 0 : i32
    %c0_i32_1 = arith.constant 0 : i32
    %c0_i32_2 = arith.constant 0 : i32
    return %c0_i32, %c0_i32_0, %c0_i32_1 : i32, i32, i32
  }
  func.func @transform_6(%arg0: i32) -> (i32, i32) {
    %c0_i32 = arith.constant 0 : i32
    %c0_i32_0 = arith.constant 0 : i32
    %c0_i32_1 = arith.constant 0 : i32
    return %c0_i32, %c0_i32_0 : i32, i32
  }
  func.func @transform_7(%arg0: i32) -> (i32, i32, i32) {
    %c0_i32 = arith.constant 0 : i32
    %c0_i32_0 = arith.constant 0 : i32
    %c0_i32_1 = arith.constant 0 : i32
    return %arg0, %c0_i32, %c0_i32_0 : i32, i32, i32
  }
}

module attributes {stable_mosaic.version = 11 : i64} {
  func.func @_ln_matmul_kernel(%arg0: i32, %arg1: memref<1x1xf32, #tpu.memory_space<vmem>>, %arg2: memref<1x1xf32, #tpu.memory_space<vmem>>, %arg3: memref<16x32xf32, #tpu.memory_space<vmem>>, %arg4: memref<32x32xf32, #tpu.memory_space<vmem>>, %arg5: memref<1x32xf32, #tpu.memory_space<vmem>>, %arg6: memref<16x32xf32, #tpu.memory_space<vmem>>) attributes {dimension_semantics = [#tpu.dimension_semantics<parallel>], iteration_bounds = array<i64: 1>, scalar_prefetch = 0 : i64, scratch_operands = 0 : i64, tpu.core_type = #tpu.core_type<tc>, window_params = [{pipeline_mode = #tpu.pipeline_mode<synchronous>, transform_indices = @transform_0, window_bounds = array<i64: 1, 1>}, {pipeline_mode = #tpu.pipeline_mode<synchronous>, transform_indices = @transform_1, window_bounds = array<i64: 1, 1>}, {transform_indices = @transform_2, window_bounds = array<i64: 16, 32>}, {pipeline_mode = #tpu.pipeline_mode<synchronous>, transform_indices = @transform_3, window_bounds = array<i64: 32, 32>}, {pipeline_mode = #tpu.pipeline_mode<synchronous>, transform_indices = @transform_4, window_bounds = array<i64: 1, 32>}, {transform_indices = @transform_5, window_bounds = array<i64: 16, 32>}]} {
    %c0 = arith.constant 0 : index
    %c0_0 = arith.constant 0 : index
    %0 = vector.load %arg3[%c0, %c0_0] : memref<16x32xf32, #tpu.memory_space<vmem>>, vector<16x32xf32>
    %c0_1 = arith.constant 0 : index
    %c0_2 = arith.constant 0 : index
    %1 = vector.load %arg1[%c0_1, %c0_2] : memref<1x1xf32, #tpu.memory_space<vmem>>, vector<1x1xf32>
    %c0_3 = arith.constant 0 : index
    %c0_4 = arith.constant 0 : index
    %2 = vector.load %arg2[%c0_3, %c0_4] : memref<1x1xf32, #tpu.memory_space<vmem>>, vector<1x1xf32>
    %cst = arith.constant dense<0.000000e+00> : vector<16xf32>
    %3 = vector.multi_reduction <add>, %0, %cst [1] : vector<16x32xf32> to vector<16xf32>
    %4 = vector.shape_cast %3 : vector<16xf32> to vector<16x1xf32>
    %cst_5 = arith.constant 3.200000e+01 : f32
    %5 = vector.broadcast %cst_5 : f32 to vector<16x1xf32>
    %6 = arith.divf %4, %5 : vector<16x1xf32>
    %7 = vector.broadcast %6 : vector<16x1xf32> to vector<16x32xf32>
    %8 = arith.subf %0, %7 : vector<16x32xf32>
    %9 = arith.mulf %8, %8 : vector<16x32xf32>
    %cst_6 = arith.constant dense<0.000000e+00> : vector<16xf32>
    %10 = vector.multi_reduction <add>, %9, %cst_6 [1] : vector<16x32xf32> to vector<16xf32>
    %11 = vector.shape_cast %10 : vector<16xf32> to vector<16x1xf32>
    %cst_7 = arith.constant 3.100000e+01 : f32
    %12 = vector.broadcast %cst_7 : f32 to vector<16x1xf32>
    %13 = arith.divf %11, %12 : vector<16x1xf32>
    %14 = vector.broadcast %1 : vector<1x1xf32> to vector<16x32xf32>
    %15 = arith.mulf %14, %8 : vector<16x32xf32>
    %16 = math.sqrt %13 : vector<16x1xf32>
    %cst_8 = arith.constant 9.99999997E-7 : f32
    %17 = vector.broadcast %cst_8 : f32 to vector<16x1xf32>
    %18 = arith.addf %16, %17 : vector<16x1xf32>
    %19 = vector.broadcast %18 : vector<16x1xf32> to vector<16x32xf32>
    %20 = arith.divf %15, %19 : vector<16x32xf32>
    %21 = vector.broadcast %2 : vector<1x1xf32> to vector<16x32xf32>
    %22 = arith.addf %20, %21 : vector<16x32xf32>
    %c0_9 = arith.constant 0 : index
    %c0_10 = arith.constant 0 : index
    %23 = vector.load %arg4[%c0_9, %c0_10] : memref<32x32xf32, #tpu.memory_space<vmem>>, vector<32x32xf32>
    %cst_11 = arith.constant dense<0.000000e+00> : vector<16x32xf32>
    %24 = tpu.matmul %22, %23, %cst_11 {dimension_numbers = #tpu.dot_dimension_numbers<[1], [0], [0], [1], [0, 0, 1, 1], [], []>} : vector<16x32xf32>, vector<32x32xf32>, vector<16x32xf32> -> vector<16x32xf32>
    %c0_12 = arith.constant 0 : index
    %c0_13 = arith.constant 0 : index
    %25 = vector.load %arg5[%c0_12, %c0_13] : memref<1x32xf32, #tpu.memory_space<vmem>>, vector<1x32xf32>
    %26 = vector.broadcast %25 : vector<1x32xf32> to vector<16x32xf32>
    %27 = arith.addf %24, %26 : vector<16x32xf32>
    %c0_14 = arith.constant 0 : index
    %c0_15 = arith.constant 0 : index
    %28 = vector.load %arg6[%c0_14, %c0_15] : memref<16x32xf32, #tpu.memory_space<vmem>>, vector<16x32xf32>
    tpu.vector_store %arg6[%c0_14, %c0_15], %27 {strides = array<i32>} : memref<16x32xf32, #tpu.memory_space<vmem>>, vector<16x32xf32>,
    return
  }
  func.func @transform_0(%arg0: i32) -> (i32, i32) {
    %c0_i32 = arith.constant 0 : i32
    %c0_i32_0 = arith.constant 0 : i32
    %c0_i32_1 = arith.constant 0 : i32
    return %c0_i32, %c0_i32_0 : i32, i32
  }
  func.func @transform_1(%arg0: i32) -> (i32, i32) {
    %c0_i32 = arith.constant 0 : i32
    %c0_i32_0 = arith.constant 0 : i32
    %c0_i32_1 = arith.constant 0 : i32
    return %c0_i32, %c0_i32_0 : i32, i32
  }
  func.func @transform_2(%arg0: i32) -> (i32, i32) {
    %c0_i32 = arith.constant 0 : i32
    %c0_i32_0 = arith.constant 0 : i32
    return %arg0, %c0_i32 : i32, i32
  }
  func.func @transform_3(%arg0: i32) -> (i32, i32) {
    %c0_i32 = arith.constant 0 : i32
    %c0_i32_0 = arith.constant 0 : i32
    %c0_i32_1 = arith.constant 0 : i32
    return %c0_i32, %c0_i32_0 : i32, i32
  }
  func.func @transform_4(%arg0: i32) -> (i32, i32) {
    %c0_i32 = arith.constant 0 : i32
    %c0_i32_0 = arith.constant 0 : i32
    %c0_i32_1 = arith.constant 0 : i32
    return %c0_i32, %c0_i32_0 : i32, i32
  }
  func.func @transform_5(%arg0: i32) -> (i32, i32) {
    %c0_i32 = arith.constant 0 : i32
    %c0_i32_0 = arith.constant 0 : i32
    return %arg0, %c0_i32 : i32, i32
  }
}

module attributes {stable_mosaic.version = 11 : i64} {
  func.func @_matmul_kernel(%arg0: i32, %arg1: memref<16x32xf32, #tpu.memory_space<vmem>>, %arg2: memref<32x64xf32, #tpu.memory_space<vmem>>, %arg3: memref<1x64xf32, #tpu.memory_space<vmem>>, %arg4: memref<16x64xf32, #tpu.memory_space<vmem>>) attributes {dimension_semantics = [#tpu.dimension_semantics<parallel>], iteration_bounds = array<i64: 1>, scalar_prefetch = 0 : i64, scratch_operands = 0 : i64, tpu.core_type = #tpu.core_type<tc>, window_params = [{transform_indices = @transform_0, window_bounds = array<i64: 16, 32>}, {pipeline_mode = #tpu.pipeline_mode<synchronous>, transform_indices = @transform_1, window_bounds = array<i64: 32, 64>}, {pipeline_mode = #tpu.pipeline_mode<synchronous>, transform_indices = @transform_2, window_bounds = array<i64: 1, 64>}, {transform_indices = @transform_3, window_bounds = array<i64: 16, 64>}]} {
    %c0 = arith.constant 0 : index
    %c0_0 = arith.constant 0 : index
    %0 = vector.load %arg1[%c0, %c0_0] : memref<16x32xf32, #tpu.memory_space<vmem>>, vector<16x32xf32>
    %c0_1 = arith.constant 0 : index
    %c0_2 = arith.constant 0 : index
    %1 = vector.load %arg2[%c0_1, %c0_2] : memref<32x64xf32, #tpu.memory_space<vmem>>, vector<32x64xf32>
    %cst = arith.constant dense<0.000000e+00> : vector<16x64xf32>
    %2 = tpu.matmul %0, %1, %cst {dimension_numbers = #tpu.dot_dimension_numbers<[1], [0], [0], [1], [0, 0, 1, 1], [], []>} : vector<16x32xf32>, vector<32x64xf32>, vector<16x64xf32> -> vector<16x64xf32>
    %c0_3 = arith.constant 0 : index
    %c0_4 = arith.constant 0 : index
    %3 = vector.load %arg3[%c0_3, %c0_4] : memref<1x64xf32, #tpu.memory_space<vmem>>, vector<1x64xf32>
    %4 = vector.broadcast %3 : vector<1x64xf32> to vector<16x64xf32>
    %5 = arith.addf %2, %4 : vector<16x64xf32>
    %c0_5 = arith.constant 0 : index
    %c0_6 = arith.constant 0 : index
    %6 = vector.load %arg4[%c0_5, %c0_6] : memref<16x64xf32, #tpu.memory_space<vmem>>, vector<16x64xf32>
    tpu.vector_store %arg4[%c0_5, %c0_6], %5 {strides = array<i32>} : memref<16x64xf32, #tpu.memory_space<vmem>>, vector<16x64xf32>,
    return
  }
  func.func @transform_0(%arg0: i32) -> (i32, i32) {
    %c0_i32 = arith.constant 0 : i32
    %c0_i32_0 = arith.constant 0 : i32
    return %arg0, %c0_i32 : i32, i32
  }
  func.func @transform_1(%arg0: i32) -> (i32, i32) {
    %c0_i32 = arith.constant 0 : i32
    %c0_i32_0 = arith.constant 0 : i32
    %c0_i32_1 = arith.constant 0 : i32
    return %c0_i32, %c0_i32_0 : i32, i32
  }
  func.func @transform_2(%arg0: i32) -> (i32, i32) {
    %c0_i32 = arith.constant 0 : i32
    %c0_i32_0 = arith.constant 0 : i32
    %c0_i32_1 = arith.constant 0 : i32
    return %c0_i32, %c0_i32_0 : i32, i32
  }
  func.func @transform_3(%arg0: i32) -> (i32, i32) {
    %c0_i32 = arith.constant 0 : i32
    %c0_i32_0 = arith.constant 0 : i32
    return %arg0, %c0_i32 : i32, i32
  }
}

module attributes {stable_mosaic.version = 11 : i64} {
  func.func @_ln_ffn_kernel(%arg0: i32, %arg1: memref<1x1xf32, #tpu.memory_space<vmem>>, %arg2: memref<1x1xf32, #tpu.memory_space<vmem>>, %arg3: memref<16x32xf32, #tpu.memory_space<vmem>>, %arg4: memref<32x64xf32, #tpu.memory_space<vmem>>, %arg5: memref<1x64xf32, #tpu.memory_space<vmem>>, %arg6: memref<64x32xf32, #tpu.memory_space<vmem>>, %arg7: memref<1x32xf32, #tpu.memory_space<vmem>>, %arg8: memref<16x32xf32, #tpu.memory_space<vmem>>) attributes {dimension_semantics = [#tpu.dimension_semantics<parallel>], iteration_bounds = array<i64: 1>, scalar_prefetch = 0 : i64, scratch_operands = 0 : i64, tpu.core_type = #tpu.core_type<tc>, window_params = [{pipeline_mode = #tpu.pipeline_mode<synchronous>, transform_indices = @transform_0, window_bounds = array<i64: 1, 1>}, {pipeline_mode = #tpu.pipeline_mode<synchronous>, transform_indices = @transform_1, window_bounds = array<i64: 1, 1>}, {transform_indices = @transform_2, window_bounds = array<i64: 16, 32>}, {pipeline_mode = #tpu.pipeline_mode<synchronous>, transform_indices = @transform_3, window_bounds = array<i64: 32, 64>}, {pipeline_mode = #tpu.pipeline_mode<synchronous>, transform_indices = @transform_4, window_bounds = array<i64: 1, 64>}, {pipeline_mode = #tpu.pipeline_mode<synchronous>, transform_indices = @transform_5, window_bounds = array<i64: 64, 32>}, {pipeline_mode = #tpu.pipeline_mode<synchronous>, transform_indices = @transform_6, window_bounds = array<i64: 1, 32>}, {transform_indices = @transform_7, window_bounds = array<i64: 16, 32>}]} {
    %c0 = arith.constant 0 : index
    %c0_0 = arith.constant 0 : index
    %0 = vector.load %arg3[%c0, %c0_0] : memref<16x32xf32, #tpu.memory_space<vmem>>, vector<16x32xf32>
    %c0_1 = arith.constant 0 : index
    %c0_2 = arith.constant 0 : index
    %1 = vector.load %arg1[%c0_1, %c0_2] : memref<1x1xf32, #tpu.memory_space<vmem>>, vector<1x1xf32>
    %c0_3 = arith.constant 0 : index
    %c0_4 = arith.constant 0 : index
    %2 = vector.load %arg2[%c0_3, %c0_4] : memref<1x1xf32, #tpu.memory_space<vmem>>, vector<1x1xf32>
    %cst = arith.constant dense<0.000000e+00> : vector<16xf32>
    %3 = vector.multi_reduction <add>, %0, %cst [1] : vector<16x32xf32> to vector<16xf32>
    %4 = vector.shape_cast %3 : vector<16xf32> to vector<16x1xf32>
    %cst_5 = arith.constant 3.200000e+01 : f32
    %5 = vector.broadcast %cst_5 : f32 to vector<16x1xf32>
    %6 = arith.divf %4, %5 : vector<16x1xf32>
    %7 = vector.broadcast %6 : vector<16x1xf32> to vector<16x32xf32>
    %8 = arith.subf %0, %7 : vector<16x32xf32>
    %9 = arith.mulf %8, %8 : vector<16x32xf32>
    %cst_6 = arith.constant dense<0.000000e+00> : vector<16xf32>
    %10 = vector.multi_reduction <add>, %9, %cst_6 [1] : vector<16x32xf32> to vector<16xf32>
    %11 = vector.shape_cast %10 : vector<16xf32> to vector<16x1xf32>
    %cst_7 = arith.constant 3.100000e+01 : f32
    %12 = vector.broadcast %cst_7 : f32 to vector<16x1xf32>
    %13 = arith.divf %11, %12 : vector<16x1xf32>
    %14 = vector.broadcast %1 : vector<1x1xf32> to vector<16x32xf32>
    %15 = arith.mulf %14, %8 : vector<16x32xf32>
    %16 = math.sqrt %13 : vector<16x1xf32>
    %cst_8 = arith.constant 9.99999997E-7 : f32
    %17 = vector.broadcast %cst_8 : f32 to vector<16x1xf32>
    %18 = arith.addf %16, %17 : vector<16x1xf32>
    %19 = vector.broadcast %18 : vector<16x1xf32> to vector<16x32xf32>
    %20 = arith.divf %15, %19 : vector<16x32xf32>
    %21 = vector.broadcast %2 : vector<1x1xf32> to vector<16x32xf32>
    %22 = arith.addf %20, %21 : vector<16x32xf32>
    %c0_9 = arith.constant 0 : index
    %c0_10 = arith.constant 0 : index
    %23 = vector.load %arg4[%c0_9, %c0_10] : memref<32x64xf32, #tpu.memory_space<vmem>>, vector<32x64xf32>
    %cst_11 = arith.constant dense<0.000000e+00> : vector<16x64xf32>
    %24 = tpu.matmul %22, %23, %cst_11 {dimension_numbers = #tpu.dot_dimension_numbers<[1], [0], [0], [1], [0, 0, 1, 1], [], []>} : vector<16x32xf32>, vector<32x64xf32>, vector<16x64xf32> -> vector<16x64xf32>
    %c0_12 = arith.constant 0 : index
    %c0_13 = arith.constant 0 : index
    %25 = vector.load %arg5[%c0_12, %c0_13] : memref<1x64xf32, #tpu.memory_space<vmem>>, vector<1x64xf32>
    %26 = vector.broadcast %25 : vector<1x64xf32> to vector<16x64xf32>
    %27 = arith.addf %24, %26 : vector<16x64xf32>
    %cst_14 = arith.constant 0.000000e+00 : f32
    %28 = vector.broadcast %cst_14 : f32 to vector<16x64xf32>
    %29 = arith.maximumf %27, %28 : vector<16x64xf32>
    %c0_15 = arith.constant 0 : index
    %c0_16 = arith.constant 0 : index
    %30 = vector.load %arg6[%c0_15, %c0_16] : memref<64x32xf32, #tpu.memory_space<vmem>>, vector<64x32xf32>
    %cst_17 = arith.constant dense<0.000000e+00> : vector<16x32xf32>
    %31 = tpu.matmul %29, %30, %cst_17 {dimension_numbers = #tpu.dot_dimension_numbers<[1], [0], [0], [1], [0, 0, 1, 1], [], []>} : vector<16x64xf32>, vector<64x32xf32>, vector<16x32xf32> -> vector<16x32xf32>
    %c0_18 = arith.constant 0 : index
    %c0_19 = arith.constant 0 : index
    %32 = vector.load %arg7[%c0_18, %c0_19] : memref<1x32xf32, #tpu.memory_space<vmem>>, vector<1x32xf32>
    %33 = vector.broadcast %32 : vector<1x32xf32> to vector<16x32xf32>
    %34 = arith.addf %31, %33 : vector<16x32xf32>
    %35 = arith.addf %0, %34 : vector<16x32xf32>
    %c0_20 = arith.constant 0 : index
    %c0_21 = arith.constant 0 : index
    %36 = vector.load %arg8[%c0_20, %c0_21] : memref<16x32xf32, #tpu.memory_space<vmem>>, vector<16x32xf32>
    tpu.vector_store %arg8[%c0_20, %c0_21], %35 {strides = array<i32>} : memref<16x32xf32, #tpu.memory_space<vmem>>, vector<16x32xf32>,
    return
  }
  func.func @transform_0(%arg0: i32) -> (i32, i32) {
    %c0_i32 = arith.constant 0 : i32
    %c0_i32_0 = arith.constant 0 : i32
    %c0_i32_1 = arith.constant 0 : i32
    return %c0_i32, %c0_i32_0 : i32, i32
  }
  func.func @transform_1(%arg0: i32) -> (i32, i32) {
    %c0_i32 = arith.constant 0 : i32
    %c0_i32_0 = arith.constant 0 : i32
    %c0_i32_1 = arith.constant 0 : i32
    return %c0_i32, %c0_i32_0 : i32, i32
  }
  func.func @transform_2(%arg0: i32) -> (i32, i32) {
    %c0_i32 = arith.constant 0 : i32
    %c0_i32_0 = arith.constant 0 : i32
    return %arg0, %c0_i32 : i32, i32
  }
  func.func @transform_3(%arg0: i32) -> (i32, i32) {
    %c0_i32 = arith.constant 0 : i32
    %c0_i32_0 = arith.constant 0 : i32
    %c0_i32_1 = arith.constant 0 : i32
    return %c0_i32, %c0_i32_0 : i32, i32
  }
  func.func @transform_4(%arg0: i32) -> (i32, i32) {
    %c0_i32 = arith.constant 0 : i32
    %c0_i32_0 = arith.constant 0 : i32
    %c0_i32_1 = arith.constant 0 : i32
    return %c0_i32, %c0_i32_0 : i32, i32
  }
  func.func @transform_5(%arg0: i32) -> (i32, i32) {
    %c0_i32 = arith.constant 0 : i32
    %c0_i32_0 = arith.constant 0 : i32
    %c0_i32_1 = arith.constant 0 : i32
    return %c0_i32, %c0_i32_0 : i32, i32
  }
  func.func @transform_6(%arg0: i32) -> (i32, i32) {
    %c0_i32 = arith.constant 0 : i32
    %c0_i32_0 = arith.constant 0 : i32
    %c0_i32_1 = arith.constant 0 : i32
    return %c0_i32, %c0_i32_0 : i32, i32
  }
  func.func @transform_7(%arg0: i32) -> (i32, i32) {
    %c0_i32 = arith.constant 0 : i32
    %c0_i32_0 = arith.constant 0 : i32
    return %arg0, %c0_i32 : i32, i32
  }
}

module attributes {stable_mosaic.version = 11 : i64} {
  func.func @_ln_matmul_kernel(%arg0: i32, %arg1: memref<1x1xf32, #tpu.memory_space<vmem>>, %arg2: memref<1x1xf32, #tpu.memory_space<vmem>>, %arg3: memref<16x32xf32, #tpu.memory_space<vmem>>, %arg4: memref<32x96xf32, #tpu.memory_space<vmem>>, %arg5: memref<1x96xf32, #tpu.memory_space<vmem>>, %arg6: memref<16x96xf32, #tpu.memory_space<vmem>>) attributes {dimension_semantics = [#tpu.dimension_semantics<parallel>], iteration_bounds = array<i64: 1>, scalar_prefetch = 0 : i64, scratch_operands = 0 : i64, tpu.core_type = #tpu.core_type<tc>, window_params = [{pipeline_mode = #tpu.pipeline_mode<synchronous>, transform_indices = @transform_0, window_bounds = array<i64: 1, 1>}, {pipeline_mode = #tpu.pipeline_mode<synchronous>, transform_indices = @transform_1, window_bounds = array<i64: 1, 1>}, {transform_indices = @transform_2, window_bounds = array<i64: 16, 32>}, {pipeline_mode = #tpu.pipeline_mode<synchronous>, transform_indices = @transform_3, window_bounds = array<i64: 32, 96>}, {pipeline_mode = #tpu.pipeline_mode<synchronous>, transform_indices = @transform_4, window_bounds = array<i64: 1, 96>}, {transform_indices = @transform_5, window_bounds = array<i64: 16, 96>}]} {
    %c0 = arith.constant 0 : index
    %c0_0 = arith.constant 0 : index
    %0 = vector.load %arg3[%c0, %c0_0] : memref<16x32xf32, #tpu.memory_space<vmem>>, vector<16x32xf32>
    %c0_1 = arith.constant 0 : index
    %c0_2 = arith.constant 0 : index
    %1 = vector.load %arg1[%c0_1, %c0_2] : memref<1x1xf32, #tpu.memory_space<vmem>>, vector<1x1xf32>
    %c0_3 = arith.constant 0 : index
    %c0_4 = arith.constant 0 : index
    %2 = vector.load %arg2[%c0_3, %c0_4] : memref<1x1xf32, #tpu.memory_space<vmem>>, vector<1x1xf32>
    %cst = arith.constant dense<0.000000e+00> : vector<16xf32>
    %3 = vector.multi_reduction <add>, %0, %cst [1] : vector<16x32xf32> to vector<16xf32>
    %4 = vector.shape_cast %3 : vector<16xf32> to vector<16x1xf32>
    %cst_5 = arith.constant 3.200000e+01 : f32
    %5 = vector.broadcast %cst_5 : f32 to vector<16x1xf32>
    %6 = arith.divf %4, %5 : vector<16x1xf32>
    %7 = vector.broadcast %6 : vector<16x1xf32> to vector<16x32xf32>
    %8 = arith.subf %0, %7 : vector<16x32xf32>
    %9 = arith.mulf %8, %8 : vector<16x32xf32>
    %cst_6 = arith.constant dense<0.000000e+00> : vector<16xf32>
    %10 = vector.multi_reduction <add>, %9, %cst_6 [1] : vector<16x32xf32> to vector<16xf32>
    %11 = vector.shape_cast %10 : vector<16xf32> to vector<16x1xf32>
    %cst_7 = arith.constant 3.100000e+01 : f32
    %12 = vector.broadcast %cst_7 : f32 to vector<16x1xf32>
    %13 = arith.divf %11, %12 : vector<16x1xf32>
    %14 = vector.broadcast %1 : vector<1x1xf32> to vector<16x32xf32>
    %15 = arith.mulf %14, %8 : vector<16x32xf32>
    %16 = math.sqrt %13 : vector<16x1xf32>
    %cst_8 = arith.constant 9.99999997E-7 : f32
    %17 = vector.broadcast %cst_8 : f32 to vector<16x1xf32>
    %18 = arith.addf %16, %17 : vector<16x1xf32>
    %19 = vector.broadcast %18 : vector<16x1xf32> to vector<16x32xf32>
    %20 = arith.divf %15, %19 : vector<16x32xf32>
    %21 = vector.broadcast %2 : vector<1x1xf32> to vector<16x32xf32>
    %22 = arith.addf %20, %21 : vector<16x32xf32>
    %c0_9 = arith.constant 0 : index
    %c0_10 = arith.constant 0 : index
    %23 = vector.load %arg4[%c0_9, %c0_10] : memref<32x96xf32, #tpu.memory_space<vmem>>, vector<32x96xf32>
    %cst_11 = arith.constant dense<0.000000e+00> : vector<16x96xf32>
    %24 = tpu.matmul %22, %23, %cst_11 {dimension_numbers = #tpu.dot_dimension_numbers<[1], [0], [0], [1], [0, 0, 1, 1], [], []>} : vector<16x32xf32>, vector<32x96xf32>, vector<16x96xf32> -> vector<16x96xf32>
    %c0_12 = arith.constant 0 : index
    %c0_13 = arith.constant 0 : index
    %25 = vector.load %arg5[%c0_12, %c0_13] : memref<1x96xf32, #tpu.memory_space<vmem>>, vector<1x96xf32>
    %26 = vector.broadcast %25 : vector<1x96xf32> to vector<16x96xf32>
    %27 = arith.addf %24, %26 : vector<16x96xf32>
    %c0_14 = arith.constant 0 : index
    %c0_15 = arith.constant 0 : index
    %28 = vector.load %arg6[%c0_14, %c0_15] : memref<16x96xf32, #tpu.memory_space<vmem>>, vector<16x96xf32>
    tpu.vector_store %arg6[%c0_14, %c0_15], %27 {strides = array<i32>} : memref<16x96xf32, #tpu.memory_space<vmem>>, vector<16x96xf32>,
    return
  }
  func.func @transform_0(%arg0: i32) -> (i32, i32) {
    %c0_i32 = arith.constant 0 : i32
    %c0_i32_0 = arith.constant 0 : i32
    %c0_i32_1 = arith.constant 0 : i32
    return %c0_i32, %c0_i32_0 : i32, i32
  }
  func.func @transform_1(%arg0: i32) -> (i32, i32) {
    %c0_i32 = arith.constant 0 : i32
    %c0_i32_0 = arith.constant 0 : i32
    %c0_i32_1 = arith.constant 0 : i32
    return %c0_i32, %c0_i32_0 : i32, i32
  }
  func.func @transform_2(%arg0: i32) -> (i32, i32) {
    %c0_i32 = arith.constant 0 : i32
    %c0_i32_0 = arith.constant 0 : i32
    return %arg0, %c0_i32 : i32, i32
  }
  func.func @transform_3(%arg0: i32) -> (i32, i32) {
    %c0_i32 = arith.constant 0 : i32
    %c0_i32_0 = arith.constant 0 : i32
    %c0_i32_1 = arith.constant 0 : i32
    return %c0_i32, %c0_i32_0 : i32, i32
  }
  func.func @transform_4(%arg0: i32) -> (i32, i32) {
    %c0_i32 = arith.constant 0 : i32
    %c0_i32_0 = arith.constant 0 : i32
    %c0_i32_1 = arith.constant 0 : i32
    return %c0_i32, %c0_i32_0 : i32, i32
  }
  func.func @transform_5(%arg0: i32) -> (i32, i32) {
    %c0_i32 = arith.constant 0 : i32
    %c0_i32_0 = arith.constant 0 : i32
    return %arg0, %c0_i32 : i32, i32
  }
}

module attributes {stable_mosaic.version = 11 : i64} {
  func.func @_layernorm_kernel(%arg0: i32, %arg1: memref<1x1xf32, #tpu.memory_space<vmem>>, %arg2: memref<1x1xf32, #tpu.memory_space<vmem>>, %arg3: memref<16x32xf32, #tpu.memory_space<vmem>>, %arg4: memref<16x32xf32, #tpu.memory_space<vmem>>) attributes {dimension_semantics = [#tpu.dimension_semantics<parallel>], iteration_bounds = array<i64: 1>, scalar_prefetch = 0 : i64, scratch_operands = 0 : i64, tpu.core_type = #tpu.core_type<tc>, window_params = [{pipeline_mode = #tpu.pipeline_mode<synchronous>, transform_indices = @transform_0, window_bounds = array<i64: 1, 1>}, {pipeline_mode = #tpu.pipeline_mode<synchronous>, transform_indices = @transform_1, window_bounds = array<i64: 1, 1>}, {transform_indices = @transform_2, window_bounds = array<i64: 16, 32>}, {transform_indices = @transform_3, window_bounds = array<i64: 16, 32>}]} {
    %c0 = arith.constant 0 : index
    %c0_0 = arith.constant 0 : index
    %0 = vector.load %arg3[%c0, %c0_0] : memref<16x32xf32, #tpu.memory_space<vmem>>, vector<16x32xf32>
    %c0_1 = arith.constant 0 : index
    %c0_2 = arith.constant 0 : index
    %1 = vector.load %arg1[%c0_1, %c0_2] : memref<1x1xf32, #tpu.memory_space<vmem>>, vector<1x1xf32>
    %c0_3 = arith.constant 0 : index
    %c0_4 = arith.constant 0 : index
    %2 = vector.load %arg2[%c0_3, %c0_4] : memref<1x1xf32, #tpu.memory_space<vmem>>, vector<1x1xf32>
    %cst = arith.constant dense<0.000000e+00> : vector<16xf32>
    %3 = vector.multi_reduction <add>, %0, %cst [1] : vector<16x32xf32> to vector<16xf32>
    %4 = vector.shape_cast %3 : vector<16xf32> to vector<16x1xf32>
    %cst_5 = arith.constant 3.200000e+01 : f32
    %5 = vector.broadcast %cst_5 : f32 to vector<16x1xf32>
    %6 = arith.divf %4, %5 : vector<16x1xf32>
    %7 = vector.broadcast %6 : vector<16x1xf32> to vector<16x32xf32>
    %8 = arith.subf %0, %7 : vector<16x32xf32>
    %9 = arith.mulf %8, %8 : vector<16x32xf32>
    %cst_6 = arith.constant dense<0.000000e+00> : vector<16xf32>
    %10 = vector.multi_reduction <add>, %9, %cst_6 [1] : vector<16x32xf32> to vector<16xf32>
    %11 = vector.shape_cast %10 : vector<16xf32> to vector<16x1xf32>
    %cst_7 = arith.constant 3.100000e+01 : f32
    %12 = vector.broadcast %cst_7 : f32 to vector<16x1xf32>
    %13 = arith.divf %11, %12 : vector<16x1xf32>
    %14 = vector.broadcast %1 : vector<1x1xf32> to vector<16x32xf32>
    %15 = arith.mulf %14, %8 : vector<16x32xf32>
    %16 = math.sqrt %13 : vector<16x1xf32>
    %cst_8 = arith.constant 9.99999997E-7 : f32
    %17 = vector.broadcast %cst_8 : f32 to vector<16x1xf32>
    %18 = arith.addf %16, %17 : vector<16x1xf32>
    %19 = vector.broadcast %18 : vector<16x1xf32> to vector<16x32xf32>
    %20 = arith.divf %15, %19 : vector<16x32xf32>
    %21 = vector.broadcast %2 : vector<1x1xf32> to vector<16x32xf32>
    %22 = arith.addf %20, %21 : vector<16x32xf32>
    %c0_9 = arith.constant 0 : index
    %c0_10 = arith.constant 0 : index
    %23 = vector.load %arg4[%c0_9, %c0_10] : memref<16x32xf32, #tpu.memory_space<vmem>>, vector<16x32xf32>
    tpu.vector_store %arg4[%c0_9, %c0_10], %22 {strides = array<i32>} : memref<16x32xf32, #tpu.memory_space<vmem>>, vector<16x32xf32>,
    return
  }
  func.func @transform_0(%arg0: i32) -> (i32, i32) {
    %c0_i32 = arith.constant 0 : i32
    %c0_i32_0 = arith.constant 0 : i32
    %c0_i32_1 = arith.constant 0 : i32
    return %c0_i32, %c0_i32_0 : i32, i32
  }
  func.func @transform_1(%arg0: i32) -> (i32, i32) {
    %c0_i32 = arith.constant 0 : i32
    %c0_i32_0 = arith.constant 0 : i32
    %c0_i32_1 = arith.constant 0 : i32
    return %c0_i32, %c0_i32_0 : i32, i32
  }
  func.func @transform_2(%arg0: i32) -> (i32, i32) {
    %c0_i32 = arith.constant 0 : i32
    %c0_i32_0 = arith.constant 0 : i32
    return %arg0, %c0_i32 : i32, i32
  }
  func.func @transform_3(%arg0: i32) -> (i32, i32) {
    %c0_i32 = arith.constant 0 : i32
    %c0_i32_0 = arith.constant 0 : i32
    return %arg0, %c0_i32 : i32, i32
  }
}

</mosaic_0001>

<bundles_post_ra>
// kernel: decoder_forward.13
= control target key start
LH: loop header
LB: loop body
LE: loop exit
PB: predicated region body
PF: predicated region fallthrough
CT: control target
= control target key end

     0   :  { %s333_s0 = inlined_call_operand.<no memory space> [shape: f32[1,1], index: 0, kind: input, shape index: {}]   ;;  %s334_s2 = inlined_call_operand.hbm [shape: f32[16,32], index: 2, kind: input, shape index: {}]   ;;  %s335_s3 = inlined_call_operand.vmem [shape: f32[32,96], index: 3, kind: input, shape index: {}]   ;;  %s336_s4 = inlined_call_operand.vmem [shape: f32[1,96], index: 4, kind: input, shape index: {}]   ;;  %s337_s5 = inlined_call_operand.vmem [shape: f32[16,96], index: 5, kind: output, shape index: {}]   ;;  %s338_s1 = inlined_call_operand.<no memory space> [shape: f32[1,1], index: 1, kind: input, shape index: {}]  }
   0x1   :  { %v10_v0 = vstv %s333_s0  ;;  %v12_v1 = vstv %s338_s1 }
   0x2   :  { %11 = vst [vmem:[#allocation2] sm:$0x1] %v10_v0 }
   0x3   :  { %13 = vst [vmem:[#allocation3] sm:$0x1] %v12_v1 }
   0x4   :  { %14 = vsyncpa [#allocation5], 0  ;;  %s23_s24 = sshll.u32 %s334_s2, 4  ;;  %s251_s25 = smov [#allocation4]   ;;  %s24_s24 = int_to_ptr.hbm [resolvable:$true] %s23_s24 }
   0x5   :  { %s25_s26 = sshll.u32 %s251_s25, 4  ;;  %s252_s27 = smov 128   ;;  %s26_s26 = int_to_ptr.vmem [resolvable:$true] %s25_s26 }
   0x6   :  { %s253_s28 = smov 8  }
   0x7   :  { %31 = dma.hbm_to_vmem [thread:$0]  %s24_s24, 256, %s26_s26, [#allocation5], %s252_s27, %s252_s27, %s253_s28  }
   0x8   :  { %249 = dma.done.wait [#allocation5], 256  }
   0x9   :  { %250 = vsyncadd [#allocation5], 4294967040  ;;  %v254_v2 = vmov 0   ;;  %vm44_vm0 = vcmask 261120   ;;  %v40_v3 = vld [vmem:[#allocation4] sm:$0xff]  ;;  %v41_v6 = vld [vmem:[#allocation4 + $0x8] sm:$0xff] }
   0xa   :  { %208 = vset.pattern.permute.xlu2 %v254_v2  ;;  %209 = vset.pattern.permute.xlu0 %v254_v2  ;;  %v45_v4 = vsel %vm44_vm0, %v40_v3, 0.0  ;;  %v210_v5 = vld [vmem:[#allocation2] ss:$0 sm:$0xff]  ;;  %v48_v7 = vsel %vm44_vm0, %v41_v6, 0.0  ;;  %v255_v8 = vmov 32.0   ;;  %v256_v26 = vmov 31.0  }
   0xb   :  { %46 = vadd.xlane.f32.xlu0 %v45_v4  ;;  %82 = vperm.xlu2 %208, %v210_v5   ;;  %213 = vrcp.f32 %v255_v8  ;;  %v211_v11 = vld [vmem:[#allocation3] ss:$0 sm:$0xff]  ;;  %v154_v32 = vld [vmem:[%s335_s3 + $0x18] sm:$0xff]  ;;  %v153_v33 = vld [vmem:[%s335_s3 + $0x10] sm:$0xff]  ;;  %vm188_vm15 = vcmask 785408  }
   0xc   :  { %215 = vrcp.f32 %v256_v26  ;;  %177 = vmatpush.msra.mxu0 %v154_v32  ;;  %198 = vmatpush.msra.mxu1 %v154_v32  ;;  %v152_v35 = vld [vmem:[%s335_s3 + $0x8] sm:$0xff]  ;;  %v151_v44 = vld [vmem:[%s335_s3] sm:$0xff] }
   0xe   :  { %178 = vmatpush.msra.mxu0 %v153_v33  ;;  %199 = vmatpush.msra.mxu1 %v153_v33 }
  0x10   :  { %179 = vmatpush.msra.mxu0 %v152_v35  ;;  %200 = vmatpush.msra.mxu1 %v152_v35 }
  0x11   :  { %v214_v9 = vpop.eup %213 }
  0x12   :  { %v52_v10 = vmul.f32 32.0, %v214_v9  ;;  %vm56_vm1 = vweird.f32 %v214_v9  ;;  %v216_v27 = vpop.eup %215  ;;  %180 = vmatpush.msra.mxu0 %v151_v44  ;;  %201 = vmatpush.msra.mxu1 %v151_v44 }
  0x13   :  { %49 = vadd.xlane.f32.xlu0 %v48_v7  ;;  %146 = vperm.xlu2 %208, %v211_v11   ;;  %v71_v28 = vmul.f32 31.0, %v216_v27  ;;  %vm75_vm2 = vweird.f32 %v216_v27 }
  0x14   :  { %v53_v12 = vsub.f32 1.0, %v52_v10 }
  0x15   :  { %v72_v29 = vsub.f32 1.0, %v71_v28  ;;  %v212_v28 = vld [vmem:[%s336_s4] ss:$0 sm:$0xff] }
  0x16   :  { %v54_v13 = vmul.f32 %v214_v9, %v53_v12 }
  0x17   :  { %v73_v30 = vmul.f32 %v216_v27, %v72_v29 }
  0x18   :  { %v55_v14 = vadd.f32 %v214_v9, %v54_v13 }
  0x19   :  { %v74_v31 = vadd.f32 %v216_v27, %v73_v30 }
  0x1a   :  { %v57_v15 = vsel %vm56_vm1, %v214_v9, %v55_v14 }
  0x1b   :  { %v76_v34 = vsel %vm75_vm2, %v216_v27, %v74_v31 }
  0x65   :  { %v83_v1 = vpop.permute.xlu2 %82 }
  0x6d   :  { %v147_v12 = vpop.permute.xlu2 %146 }
  0x7e   :  { %v47_v16 = vpop.xlane.xlu0 %46 }
  0x7f   :  { %v58_v17 = vmul.f32 %v57_v15, %v47_v16 }
  0x81   :  { %v298_v18 = vsub.f32 %v40_v3, %v58_v17 }
  0x83   :  { %v62_v19 = vmul.f32 %v298_v18, %v298_v18  ;;  %v85_v9 = vmul.f32 %v83_v1, %v298_v18 }
  0x85   :  { %v64_v20 = vsel %vm44_vm0, %v62_v19, 0.0 }
  0x86   :  { %65 = vadd.xlane.f32.xlu1 %v64_v20  ;;  %v50_v21 = vpop.xlane.xlu0 %49 }
  0x87   :  { %v59_v22 = vmul.f32 %v57_v15, %v50_v21 }
  0x89   :  { %v303_v23 = vsub.f32 %v41_v6, %v59_v22 }
  0x8b   :  { %v63_v24 = vmul.f32 %v303_v23, %v303_v23  ;;  %v86_v18 = vmul.f32 %v83_v1, %v303_v23 }
  0x8d   :  { %v67_v25 = vsel %vm44_vm0, %v63_v24, 0.0 }
  0x8e   :  { %68 = vadd.xlane.f32.xlu1 %v67_v25 }
  0xf9   :  { %v66_v36 = vpop.xlane.xlu1 %65 }
  0xfa   :  { %v77_v37 = vmul.f32 %v76_v34, %v66_v36 }
  0xfc   :  { %217 = vrsqrt.f32 %v77_v37  ;;  %vm94_vm3 = vcmp.eq.f32.partialorder %v77_v37, inf  ;;  %v97_v51 = vand.u32 2147483648, %v77_v37  ;;  %vm96_vm4 = vcmp.eq.f32.partialorder %v77_v37, 0.0 }
 0x101   :  { %v69_v38 = vpop.xlane.xlu1 %68 }
 0x102   :  { %v218_v39 = vpop.eup %217  ;;  %v78_v40 = vmul.f32 %v76_v34, %v69_v38 }
 0x103   :  { %v88_v41 = vmul.f32 %v218_v39, %v77_v37 }
 0x104   :  { %219 = vrsqrt.f32 %v78_v40  ;;  %vm106_vm5 = vcmp.eq.f32.partialorder %v78_v40, inf  ;;  %v109_v59 = vand.u32 2147483648, %v78_v40  ;;  %vm108_vm6 = vcmp.eq.f32.partialorder %v78_v40, 0.0 }
 0x105   :  { %v89_v42 = vmul.f32 %v218_v39, %v88_v41 }
 0x107   :  { %v90_v43 = vmul.f32 0.5, %v89_v42 }
 0x109   :  { %v91_v45 = vsub.f32 1.5, %v90_v43 }
 0x10a   :  { %v220_v46 = vpop.eup %219 }
 0x10b   :  { %v92_v47 = vmul.f32 %v218_v39, %v91_v45  ;;  %v100_v48 = vmul.f32 %v220_v46, %v78_v40 }
 0x10d   :  { %v93_v49 = vmul.f32 %v92_v47, %v77_v37  ;;  %v101_v50 = vmul.f32 %v220_v46, %v100_v48 }
 0x10f   :  { %v102_v52 = vmul.f32 0.5, %v101_v50  ;;  %v95_v53 = vsel %vm94_vm3, %v77_v37, %v93_v49 }
 0x110   :  { %v98_v54 = vsel %vm96_vm4, %v97_v51, %v95_v53 }
 0x111   :  { %v103_v55 = vsub.f32 1.5, %v102_v52  ;;  %v111_v56 = vadd.f32 1e-06, %v98_v54 }
 0x113   :  { %v104_v57 = vmul.f32 %v220_v46, %v103_v55  ;;  %221 = vrcp.f32 %v111_v56  ;;  %v124_v3 = vand.u32 2147483648, %v111_v56  ;;  %v122_v5 = vand.u32 2147483647, %v111_v56 }
 0x114   :  { %vm118_vm8 = vweird.f32 %v111_v56 }
 0x115   :  { %v105_v58 = vmul.f32 %v104_v57, %v78_v40  ;;  %v125_v8 = vor.u32 1.1754944e-38, %v124_v3  ;;  %vm123_vm10 = vcmp.eq.f32.partialorder %v122_v5, 8.507059e+37 }
 0x117   :  { %v107_v60 = vsel %vm106_vm5, %v78_v40, %v105_v58 }
 0x118   :  { %v110_v61 = vsel %vm108_vm6, %v109_v59, %v107_v60 }
 0x119   :  { %v222_v62 = vpop.eup %221  ;;  %v112_v63 = vadd.f32 1e-06, %v110_v61 }
 0x11a   :  { %v114_v0 = vmul.f32 %v222_v62, %v111_v56  ;;  %vm119_vm7 = vweird.f32 %v222_v62 }
 0x11b   :  { %223 = vrcp.f32 %v112_v63  ;;  %vm120_vm9 = vmor %vm118_vm8, %vm119_vm7  ;;  %v139_v16 = vand.u32 2147483648, %v112_v63  ;;  %v137_v19 = vand.u32 2147483647, %v112_v63  ;;  %vm133_vm12 = vweird.f32 %v112_v63 }
 0x11c   :  { %v115_v2 = vsub.f32 1.0, %v114_v0 }
 0x11d   :  { %v140_v22 = vor.u32 1.1754944e-38, %v139_v16  ;;  %vm138_vm14 = vcmp.eq.f32.partialorder %v137_v19, 8.507059e+37 }
 0x11e   :  { %v116_v4 = vmul.f32 %v222_v62, %v115_v2 }
 0x120   :  { %v117_v6 = vadd.f32 %v222_v62, %v116_v4 }
 0x121   :  { %v224_v7 = vpop.eup %223 }
 0x122   :  { %v121_v10 = vsel %vm120_vm9, %v222_v62, %v117_v6  ;;  %v129_v11 = vmul.f32 %v224_v7, %v112_v63  ;;  %vm134_vm11 = vweird.f32 %v224_v7 }
 0x123   :  { %v126_v13 = vsel %vm123_vm10, %v125_v8, %v121_v10  ;;  %vm135_vm13 = vmor %vm133_vm12, %vm134_vm11 }
 0x124   :  { %v127_v14 = vmul.f32 %v126_v13, %v85_v9  ;;  %v130_v15 = vsub.f32 1.0, %v129_v11 }
 0x126   :  { %v131_v17 = vmul.f32 %v224_v7, %v130_v15  ;;  %v149_v20 = vadd.f32 %v147_v12, %v127_v14 }
 0x128   :  { %v132_v21 = vadd.f32 %v224_v7, %v131_v17  ;;  %196 = vmatmul.msk.f32.vlgmr.msra.gmra.mxu0 %vm44_vm0, %v149_v20 }
 0x12a   :  { %v136_v24 = vsel %vm135_vm13, %v224_v7, %v132_v21 }
 0x12b   :  { %v141_v25 = vsel %vm138_vm14, %v140_v22, %v136_v24 }
 0x12c   :  { %v142_v26 = vmul.f32 %v141_v25, %v86_v18 }
 0x12e   :  { %v150_v27 = vadd.f32 %v147_v12, %v142_v26 }
 0x130   :  { %197 = vmatmul.msk.f32.vlgmr.msra.gmra.mxu1 %vm44_vm0, %v150_v27 }
 0x1a5   :  { %v182_v29 = vpop.f32.mrf.mxu0 }
 0x1a6   :  { %v183_v30 = vadd.f32 %v212_v28, %v182_v29 }
 0x1a8   :  { %189 = vst.msk [vmem:[%s337_s5] sm:$0xff] %vm188_vm15, %v183_v30 }
 0x1ad   :  { %v185_v31 = vpop.f32.mrf.mxu1 }
 0x1ae   :  { %v186_v23 = vadd.f32 %v212_v28, %v185_v31 }
 0x1b0   :  { %190 = vst.msk [vmem:[%s337_s5 + $0x8] sm:$0xff] %vm188_vm15, %v186_v23 }
 0x1b1   :  { %195 = vsyncpa [#allocation5], 1 }

// kernel: decoder_forward.15
= control target key start
LH: loop header
LB: loop body
LE: loop exit
PB: predicated region body
PF: predicated region fallthrough
CT: control target
= control target key end

     0   :  { %vm28_vm0 = vcmask 261120   ;;  %v204_v1 = vmov 0   ;;  %v205_v7 = vmov 32.0   ;;  %v206_v26 = vmov 31.0   ;;  %s288_s2 = inlined_call_operand.vmem [shape: f32[16,32], index: 2, kind: input, shape index: {}]   ;;  %s289_s0 = inlined_call_operand.<no memory space> [shape: f32[1,1], index: 0, kind: input, shape index: {}]   ;;  %s290_s1 = inlined_call_operand.<no memory space> [shape: f32[1,1], index: 1, kind: input, shape index: {}]   ;;  %s291_s4 = inlined_call_operand.vmem [shape: f32[1,32], index: 4, kind: input, shape index: {}]   ;;  %s292_s3 = inlined_call_operand.vmem [shape: f32[32,32], index: 3, kind: input, shape index: {}]   ;;  %s293_s5 = inlined_call_operand.vmem [shape: f32[16,32], index: 5, kind: output, shape index: {}]  }
   0x1   :  { %v24_v0 = vld [vmem:[%s288_s2] sm:$0xff]  ;;  %187 = vset.pattern.permute.xlu2 %v204_v1  ;;  %v10_v2 = vstv %s289_s0  ;;  %188 = vset.pattern.permute.xlu0 %v204_v1  ;;  %v25_v4 = vld [vmem:[%s288_s2 + $0x8] sm:$0xff]  ;;  %192 = vrcp.f32 %v205_v7  ;;  %v12_v10 = vstv %s290_s1 }
   0x2   :  { %v29_v3 = vsel %vm28_vm0, %v24_v0, 0.0  ;;  %11 = vst [vmem:[#allocation2] sm:$0x1] %v10_v2  ;;  %v32_v5 = vsel %vm28_vm0, %v25_v4, 0.0  ;;  %194 = vrcp.f32 %v206_v26  ;;  %v138_v32 = vld [vmem:[%s292_s3 + $0x18] sm:$0xff]  ;;  %v137_v33 = vld [vmem:[%s292_s3 + $0x10] sm:$0xff] }
   0x3   :  { %30 = vadd.xlane.f32.xlu0 %v29_v3  ;;  %13 = vst [vmem:[#allocation3] sm:$0x1] %v12_v10  ;;  %161 = vmatpush.msra.mxu0 %v138_v32  ;;  %v136_v35 = vld [vmem:[%s292_s3 + $0x8] sm:$0xff]  ;;  %v135_v44 = vld [vmem:[%s292_s3] sm:$0xff] }
   0x4   :  { %180 = vmatpush.msra.mxu1 %v138_v32 }
   0x5   :  { %162 = vmatpush.msra.mxu0 %v137_v33 }
   0x6   :  { %181 = vmatpush.msra.mxu1 %v137_v33 }
   0x7   :  { %v193_v8 = vpop.eup %192  ;;  %163 = vmatpush.msra.mxu0 %v136_v35 }
   0x8   :  { %v36_v9 = vmul.f32 32.0, %v193_v8  ;;  %vm40_vm1 = vweird.f32 %v193_v8  ;;  %v195_v27 = vpop.eup %194  ;;  %182 = vmatpush.msra.mxu1 %v136_v35 }
   0x9   :  { %v189_v6 = vld [vmem:[#allocation2] ss:$0 sm:$0xff]  ;;  %v55_v28 = vmul.f32 31.0, %v195_v27  ;;  %vm59_vm2 = vweird.f32 %v195_v27  ;;  %164 = vmatpush.msra.mxu0 %v135_v44 }
   0xa   :  { %66 = vperm.xlu2 %187, %v189_v6   ;;  %v37_v11 = vsub.f32 1.0, %v36_v9  ;;  %v190_v13 = vld [vmem:[#allocation3] ss:$0 sm:$0xff]  ;;  %183 = vmatpush.msra.mxu1 %v135_v44 }
   0xb   :  { %33 = vadd.xlane.f32.xlu0 %v32_v5  ;;  %v56_v29 = vsub.f32 1.0, %v55_v28  ;;  %v191_v28 = vld [vmem:[%s291_s4] ss:$0 sm:$0xff] }
   0xc   :  { %v38_v12 = vmul.f32 %v193_v8, %v37_v11 }
   0xd   :  { %v57_v30 = vmul.f32 %v195_v27, %v56_v29 }
   0xe   :  { %v39_v14 = vadd.f32 %v193_v8, %v38_v12 }
   0xf   :  { %v58_v31 = vadd.f32 %v195_v27, %v57_v30 }
  0x10   :  { %v41_v15 = vsel %vm40_vm1, %v193_v8, %v39_v14 }
  0x11   :  { %v60_v34 = vsel %vm59_vm2, %v195_v27, %v58_v31 }
  0x12   :  { %130 = vperm.xlu2 %187, %v190_v13  }
  0x64   :  { %v67_v1 = vpop.permute.xlu2 %66 }
  0x6c   :  { %v131_v13 = vpop.permute.xlu2 %130 }
  0x76   :  { %v31_v16 = vpop.xlane.xlu0 %30 }
  0x77   :  { %v42_v17 = vmul.f32 %v41_v15, %v31_v16 }
  0x79   :  { %v251_v18 = vsub.f32 %v24_v0, %v42_v17 }
  0x7b   :  { %v46_v19 = vmul.f32 %v251_v18, %v251_v18  ;;  %v69_v9 = vmul.f32 %v67_v1, %v251_v18 }
  0x7d   :  { %v48_v20 = vsel %vm28_vm0, %v46_v19, 0.0 }
  0x7e   :  { %49 = vadd.xlane.f32.xlu1 %v48_v20  ;;  %v34_v21 = vpop.xlane.xlu0 %33 }
  0x7f   :  { %v43_v22 = vmul.f32 %v41_v15, %v34_v21 }
  0x81   :  { %v256_v23 = vsub.f32 %v25_v4, %v43_v22 }
  0x83   :  { %v47_v24 = vmul.f32 %v256_v23, %v256_v23  ;;  %v70_v18 = vmul.f32 %v67_v1, %v256_v23 }
  0x85   :  { %v51_v25 = vsel %vm28_vm0, %v47_v24, 0.0 }
  0x86   :  { %52 = vadd.xlane.f32.xlu1 %v51_v25 }
  0xf1   :  { %v50_v36 = vpop.xlane.xlu1 %49 }
  0xf2   :  { %v61_v37 = vmul.f32 %v60_v34, %v50_v36 }
  0xf4   :  { %196 = vrsqrt.f32 %v61_v37  ;;  %vm78_vm3 = vcmp.eq.f32.partialorder %v61_v37, inf  ;;  %v81_v51 = vand.u32 2147483648, %v61_v37  ;;  %vm80_vm4 = vcmp.eq.f32.partialorder %v61_v37, 0.0 }
  0xf9   :  { %v53_v38 = vpop.xlane.xlu1 %52 }
  0xfa   :  { %v197_v39 = vpop.eup %196  ;;  %v62_v40 = vmul.f32 %v60_v34, %v53_v38 }
  0xfb   :  { %v72_v41 = vmul.f32 %v197_v39, %v61_v37 }
  0xfc   :  { %198 = vrsqrt.f32 %v62_v40  ;;  %vm90_vm5 = vcmp.eq.f32.partialorder %v62_v40, inf  ;;  %v93_v59 = vand.u32 2147483648, %v62_v40  ;;  %vm92_vm6 = vcmp.eq.f32.partialorder %v62_v40, 0.0 }
  0xfd   :  { %v73_v42 = vmul.f32 %v197_v39, %v72_v41 }
  0xff   :  { %v74_v43 = vmul.f32 0.5, %v73_v42 }
 0x101   :  { %v75_v45 = vsub.f32 1.5, %v74_v43 }
 0x102   :  { %v199_v46 = vpop.eup %198 }
 0x103   :  { %v76_v47 = vmul.f32 %v197_v39, %v75_v45  ;;  %v84_v48 = vmul.f32 %v199_v46, %v62_v40 }
 0x105   :  { %v77_v49 = vmul.f32 %v76_v47, %v61_v37  ;;  %v85_v50 = vmul.f32 %v199_v46, %v84_v48 }
 0x107   :  { %v86_v52 = vmul.f32 0.5, %v85_v50  ;;  %v79_v53 = vsel %vm78_vm3, %v61_v37, %v77_v49 }
 0x108   :  { %v82_v54 = vsel %vm80_vm4, %v81_v51, %v79_v53 }
 0x109   :  { %v87_v55 = vsub.f32 1.5, %v86_v52  ;;  %v95_v56 = vadd.f32 1e-06, %v82_v54 }
 0x10b   :  { %v88_v57 = vmul.f32 %v199_v46, %v87_v55  ;;  %200 = vrcp.f32 %v95_v56  ;;  %v108_v3 = vand.u32 2147483648, %v95_v56  ;;  %v106_v5 = vand.u32 2147483647, %v95_v56 }
 0x10c   :  { %vm102_vm8 = vweird.f32 %v95_v56 }
 0x10d   :  { %v89_v58 = vmul.f32 %v88_v57, %v62_v40  ;;  %v109_v8 = vor.u32 1.1754944e-38, %v108_v3  ;;  %vm107_vm10 = vcmp.eq.f32.partialorder %v106_v5, 8.507059e+37 }
 0x10f   :  { %v91_v60 = vsel %vm90_vm5, %v62_v40, %v89_v58 }
 0x110   :  { %v94_v61 = vsel %vm92_vm6, %v93_v59, %v91_v60 }
 0x111   :  { %v201_v62 = vpop.eup %200  ;;  %v96_v63 = vadd.f32 1e-06, %v94_v61 }
 0x112   :  { %v98_v0 = vmul.f32 %v201_v62, %v95_v56  ;;  %vm103_vm7 = vweird.f32 %v201_v62 }
 0x113   :  { %202 = vrcp.f32 %v96_v63  ;;  %vm104_vm9 = vmor %vm102_vm8, %vm103_vm7  ;;  %v123_v16 = vand.u32 2147483648, %v96_v63  ;;  %v121_v19 = vand.u32 2147483647, %v96_v63  ;;  %vm117_vm12 = vweird.f32 %v96_v63 }
 0x114   :  { %v99_v2 = vsub.f32 1.0, %v98_v0 }
 0x115   :  { %v124_v22 = vor.u32 1.1754944e-38, %v123_v16  ;;  %vm122_vm14 = vcmp.eq.f32.partialorder %v121_v19, 8.507059e+37 }
 0x116   :  { %v100_v4 = vmul.f32 %v201_v62, %v99_v2 }
 0x118   :  { %v101_v6 = vadd.f32 %v201_v62, %v100_v4 }
 0x119   :  { %v203_v7 = vpop.eup %202 }
 0x11a   :  { %v105_v10 = vsel %vm104_vm9, %v201_v62, %v101_v6  ;;  %v113_v11 = vmul.f32 %v203_v7, %v96_v63  ;;  %vm118_vm11 = vweird.f32 %v203_v7 }
 0x11b   :  { %v110_v12 = vsel %vm107_vm10, %v109_v8, %v105_v10  ;;  %vm119_vm13 = vmor %vm117_vm12, %vm118_vm11 }
 0x11c   :  { %v111_v14 = vmul.f32 %v110_v12, %v69_v9  ;;  %v114_v15 = vsub.f32 1.0, %v113_v11 }
 0x11e   :  { %v115_v17 = vmul.f32 %v203_v7, %v114_v15  ;;  %v133_v20 = vadd.f32 %v131_v13, %v111_v14 }
 0x120   :  { %v116_v21 = vadd.f32 %v203_v7, %v115_v17  ;;  %178 = vmatmul.msk.f32.vlgmr.msra.gmra.mxu0 %vm28_vm0, %v133_v20 }
 0x122   :  { %v120_v24 = vsel %vm119_vm13, %v203_v7, %v116_v21 }
 0x123   :  { %v125_v25 = vsel %vm122_vm14, %v124_v22, %v120_v24 }
 0x124   :  { %v126_v26 = vmul.f32 %v125_v25, %v70_v18 }
 0x126   :  { %v134_v27 = vadd.f32 %v131_v13, %v126_v26 }
 0x128   :  { %179 = vmatmul.msk.f32.vlgmr.msra.gmra.mxu1 %vm28_vm0, %v134_v27 }
 0x19d   :  { %v166_v29 = vpop.f32.mrf.mxu0 }
 0x19e   :  { %v167_v30 = vadd.f32 %v191_v28, %v166_v29 }
 0x1a0   :  { %172 = vst.msk [vmem:[%s293_s5] sm:$0xff] %vm28_vm0, %v167_v30 }
 0x1a5   :  { %v169_v31 = vpop.f32.mrf.mxu1 }
 0x1a6   :  { %v170_v23 = vadd.f32 %v191_v28, %v169_v31 }
 0x1a8   :  { %173 = vst.msk [vmem:[%s293_s5 + $0x8] sm:$0xff] %vm28_vm0, %v170_v23 }

// kernel: decoder_forward.16
= control target key start
LH: loop header
LB: loop body
LE: loop exit
PB: predicated region body
PF: predicated region fallthrough
CT: control target
= control target key end

     0   :  { %vm24_vm0 = vcmask 261120   ;;  %vm54_vm1 = vcmask 523264   ;;  %s115_s1 = inlined_call_operand.vmem [shape: f32[32,64], index: 1, kind: input, shape index: {}]   ;;  %s116_s2 = inlined_call_operand.vmem [shape: f32[1,64], index: 2, kind: input, shape index: {}]   ;;  %s117_s0 = inlined_call_operand.vmem [shape: f32[16,32], index: 0, kind: input, shape index: {}]   ;;  %s118_s3 = inlined_call_operand.vmem [shape: f32[16,64], index: 3, kind: output, shape index: {}]  }
   0x1   :  { %v19_v0 = vld [vmem:[%s115_s1 + $0x18] sm:$0xff]  ;;  %v18_v1 = vld [vmem:[%s115_s1 + $0x10] sm:$0xff]  ;;  %v17_v2 = vld [vmem:[%s115_s1 + $0x8] sm:$0xff] }
   0x2   :  { %43 = vmatpush.msra.mxu0 %v19_v0  ;;  %63 = vmatpush.msra.mxu1 %v19_v0  ;;  %v16_v3 = vld [vmem:[%s115_s1] sm:$0xff]  ;;  %v15_v5 = vld [vmem:[%s117_s0 + $0x8] sm:$0xff] }
   0x3   :  { %v14_v4 = vld [vmem:[%s117_s0] sm:$0xff] }
   0x4   :  { %44 = vmatpush.msra.mxu0 %v18_v1  ;;  %64 = vmatpush.msra.mxu1 %v18_v1  ;;  %v67_v6 = vld [vmem:[%s116_s2] ss:$0 sm:$0xff] }
   0x6   :  { %45 = vmatpush.msra.mxu0 %v17_v2  ;;  %65 = vmatpush.msra.mxu1 %v17_v2 }
   0x8   :  { %46 = vmatpush.msra.mxu0 %v16_v3  ;;  %66 = vmatpush.msra.mxu1 %v16_v3 }
   0x9   :  { %61 = vmatmul.msk.f32.vlgmr.msra.gmra.mxu0 %vm24_vm0, %v14_v4  ;;  %62 = vmatmul.msk.f32.vlgmr.msra.gmra.mxu1 %vm24_vm0, %v15_v5 }
  0x86   :  { %v48_v7 = vpop.f32.mrf.mxu0  ;;  %v51_v8 = vpop.f32.mrf.mxu1 }
  0x87   :  { %v49_v9 = vadd.f32 %v67_v6, %v48_v7  ;;  %v52_v10 = vadd.f32 %v67_v6, %v51_v8 }
  0x89   :  { %55 = vst.msk [vmem:[%s118_s3] sm:$0xff] %vm54_vm1, %v49_v9 }
  0x8a   :  { %56 = vst.msk [vmem:[%s118_s3 + $0x8] sm:$0xff] %vm54_vm1, %v52_v10 }

// kernel: decoder_forward.14
= control target key start
LH: loop header
LB: loop body
LE: loop exit
PB: predicated region body
PF: predicated region fallthrough
CT: control target
= control target key end

     0   :  { %s937_s24 = smov 0   ;;  %s1024_s0 = inlined_call_operand.vmem [shape: f32[2,4,8,8], index: 0, kind: input, shape index: {}]   ;;  %s1025_s1 = inlined_call_operand.vmem [shape: f32[2,4,8,8], index: 1, kind: input, shape index: {}]   ;;  %s1026_s2 = inlined_call_operand.vmem [shape: f32[2,4,8,8], index: 2, kind: input, shape index: {}]   ;;  %s1027_s3 = inlined_call_operand.vmem [shape: f32[2,8,8], index: 3, kind: input, shape index: {}]   ;;  %s1028_s4 = inlined_call_operand.vmem [shape: f32[2,8,32], index: 4, kind: input, shape index: {}]   ;;  %s1029_s5 = inlined_call_operand.vmem [shape: f32[4,8,32], index: 5, kind: input, shape index: {}]   ;;  %s1030_s6 = inlined_call_operand.vmem [shape: f32[1,32], index: 6, kind: input, shape index: {}]   ;;  %s1031_s7 = inlined_call_operand.vmem [shape: f32[2,8,32], index: 7, kind: output, shape index: {}]  }
   0x1 LB: > { %s829_s25 = sadd.s32 4294967295, %s895_s24   ;;  %p833_p0 = scmp.ge.s32.totalorder %s895_s24, 1  ;;  %s895_s24 = sphi %s937_s24, %s17_s24  }
   0x2   : > { %p275_p1 = scmp.lt.s32.totalorder %s895_s24, 3 }
   0x4   : > { %p276_p2 = pnand %p833_p0, %p275_p1 }
   0x5   : > { %p324_p3 = scmp.lt.s32.totalorder (!%p276_p2), %s829_s25, 1 }
   0x6   : > { %279 = sbr.rel (%p276_p2) target bundleno = 687 (0x2af), region = 48 }
   0xb   : > { %s1033_s25 = smov (!%p324_p3, %s829_s25), 1  ;;  %vm364_vm0 = vcmask 64512   ;;  %v616_v61 = vld [vmem:[%s1029_s5] sm:$0xff]  ;;  %v617_v62 = vld [vmem:[%s1029_s5 + $0x8] sm:$0xff]  ;;  %v618_v63 = vld [vmem:[%s1029_s5 + $0x10] sm:$0xff]  ;;  %vm712_vm2 = vcmask 261120  }
   0xc   : > { %s945_s26 = sshll.u32 %s1033_s25, 5  ;;  %s963_s10 = sshll.u32 %s1033_s25, 3 }
   0xd   : > { %s333_s29 = scalar_lea.vmem %s1025_s1, %s945_s26  ;;  %s328_s9 = scalar_lea.vmem %s1024_s0, %s945_s26 }
   0xe   : > { %v355_v0 = vld [vmem:[%s333_s29] sm:$0xff]  ;;  %v357_v1 = vld [vmem:[%s333_s29 + $0x10] sm:$0xff]  ;;  %v356_v4 = vld [vmem:[%s333_s29 + $0x8] sm:$0xff]  ;;  %s342_s13 = scalar_lea.vmem %s1027_s3, %s963_s10  ;;  %s338_s16 = scalar_lea.vmem %s1026_s2, %s945_s26 }
   0xf   : > { %v351_v2 = vld [vmem:[%s328_s9] sm:$0xff]  ;;  %843 = vmatpush.xpose.msk.msra.mxu0 %vm364_vm0, %v355_v0  ;;  %847 = vmatpush.xpose.msk.msra.mxu2 %vm364_vm0, %v357_v1  ;;  %v353_v3 = vld [vmem:[%s328_s9 + $0x10] sm:$0xff]  ;;  %v358_v5 = vld [vmem:[%s333_s29 + $0x18] sm:$0xff]  ;;  %s346_s28 = scalar_lea.vmem %s1028_s4, %s963_s10  ;;  %s350_s11 = scalar_lea.vmem %s1031_s7, %s963_s10 }
  0x10   : > { %845 = vmatpush.xpose.msk.msra.mxu1 %vm364_vm0, %v356_v4  ;;  %849 = vmatpush.xpose.msk.msra.mxu3 %vm364_vm0, %v358_v5  ;;  %v352_v6 = vld [vmem:[%s328_s9 + $0x8] sm:$0xff]  ;;  %v354_v7 = vld [vmem:[%s328_s9 + $0x18] sm:$0xff]  ;;  %v363_v8 = vld [vmem:[%s342_s13] sm:$0xff] }
  0x11   : > { %vm473_vm1 = vcmp.eq.f32.partialorder %v363_v8, 0.0  ;;  %v359_v45 = vld [vmem:[%s338_s16] sm:$0xff]  ;;  %v361_v46 = vld [vmem:[%s338_s16 + $0x10] sm:$0xff]  ;;  %v360_v47 = vld [vmem:[%s338_s16 + $0x8] sm:$0xff] }
  0x12   : > { %844 = vmatmul.msk.f32.vlgmr.msra.gmra.mxu0 %vm364_vm0, %v351_v2  ;;  %848 = vmatmul.msk.f32.vlgmr.msra.gmra.mxu2 %vm364_vm0, %v353_v3  ;;  %v362_v48 = vld [vmem:[%s338_s16 + $0x18] sm:$0xff] }
  0x13   : > { %846 = vmatmul.msk.f32.vlgmr.msra.gmra.mxu1 %vm364_vm0, %v352_v6  ;;  %850 = vmatmul.msk.f32.vlgmr.msra.gmra.mxu3 %vm364_vm0, %v354_v7  ;;  %v619_v0 = vld [vmem:[%s1029_s5 + $0x18] sm:$0xff] }
  0x14   : > { %542 = vmatpush.msrb.mxu0 %v359_v45  ;;  %588 = vmatpush.msrb.mxu2 %v361_v46 }
  0x15   : > { %565 = vmatpush.msrb.mxu1 %v360_v47  ;;  %611 = vmatpush.msrb.mxu3 %v362_v48 }
  0x16   : > { %638 = vmatpush.msra.mxu0 %v616_v61  ;;  %684 = vmatpush.msra.mxu2 %v618_v63 }
  0x17   : > { %661 = vmatpush.msra.mxu1 %v617_v62  ;;  %707 = vmatpush.msra.mxu3 %v619_v0 }
  0x8f   : > { %v388_v9 = vpop.f32.mrf.mxu0 }
  0x90   : > { %v469_v10 = vmul.f32 0.35355338, %v388_v9  ;;  %v414_v11 = vpop.f32.mrf.mxu1 }
  0x91   : > { %v470_v13 = vmul.f32 0.35355338, %v414_v11 }
  0x92   : > { %v476_v12 = vsel %vm473_vm1, -1e+09, %v469_v10 }
  0x93   : > { %v480_v14 = vsel %vm364_vm0, %v476_v12, -inf  ;;  %v477_v17 = vsel %vm473_vm1, -1e+09, %v470_v13 }
  0x94   : > { %481 = vmax.xlane.f32.xlu1 %v480_v14  ;;  %v483_v22 = vsel %vm364_vm0, %v477_v17, -inf  ;;  %v872_v14 = vld [vmem:[%s1030_s6] ss:$0 sm:$0xff] }
  0x95   : > { %v440_v15 = vpop.f32.mrf.mxu2 }
  0x96   : > { %v471_v16 = vmul.f32 0.35355338, %v440_v15  ;;  %v466_v18 = vpop.f32.mrf.mxu3 }
  0x97   : > { %v472_v20 = vmul.f32 0.35355338, %v466_v18 }
  0x98   : > { %v478_v19 = vsel %vm473_vm1, -1e+09, %v471_v16 }
  0x99   : > { %v486_v21 = vsel %vm364_vm0, %v478_v19, -inf  ;;  %v479_v23 = vsel %vm473_vm1, -1e+09, %v472_v20 }
  0x9a   : > { %487 = vmax.xlane.f32.xlu0 %v486_v21  ;;  %v489_v24 = vsel %vm364_vm0, %v479_v23, -inf }
  0x9c   : > { %484 = vmax.xlane.f32.xlu1 %v483_v22 }
  0xa2   : > { %490 = vmax.xlane.f32.xlu0 %v489_v24 }
 0x107   : > { %v482_v25 = vpop.xlane.xlu1 %481 }
 0x108   : > { %v492_v26 = vsub.f32 %v476_v12, %v482_v25 }
 0x10a   : > { %v496_v27 = vmul.f32 1.442695, %v492_v26 }
 0x10c   : > { %873 = vpow2.f32 %v496_v27 }
 0x10d   : > { %v488_v28 = vpop.xlane.xlu0 %487 }
 0x10e   : > { %v494_v29 = vsub.f32 %v478_v19, %v488_v28 }
 0x10f   : > { %v485_v30 = vpop.xlane.xlu1 %484 }
 0x110   : > { %v500_v31 = vmul.f32 1.442695, %v494_v29  ;;  %v493_v32 = vsub.f32 %v477_v17, %v485_v30  ;;  %v725_v17 = vld [vmem:[%s346_s28] sm:$0xff] }
 0x112   : > { %v874_v33 = vpop.eup %873  ;;  %875 = vpow2.f32 %v500_v31  ;;  %v498_v34 = vmul.f32 1.442695, %v493_v32 }
 0x113   : > { %v504_v35 = vsel %vm364_vm0, %v874_v33, 0.0 }
 0x114   : > { %877 = vpow2.f32 %v498_v34  ;;  %505 = vadd.xlane.f32.xlu0 %v504_v35 }
 0x115   : > { %v491_v36 = vpop.xlane.xlu0 %490 }
 0x116   : > { %v495_v37 = vsub.f32 %v479_v23, %v491_v36 }
 0x118   : > { %v876_v38 = vpop.eup %875  ;;  %v502_v39 = vmul.f32 1.442695, %v495_v37 }
 0x119   : > { %v510_v40 = vsel %vm364_vm0, %v876_v38, 0.0 }
 0x11a   : > { %v878_v41 = vpop.eup %877  ;;  %879 = vpow2.f32 %v502_v39  ;;  %511 = vadd.xlane.f32.xlu2 %v510_v40 }
 0x11b   : > { %v507_v42 = vsel %vm364_vm0, %v878_v41, 0.0 }
 0x11c   : > { %508 = vadd.xlane.f32.xlu1 %v507_v42 }
 0x120   : > { %v880_v43 = vpop.eup %879 }
 0x121   : > { %v513_v44 = vsel %vm364_vm0, %v880_v43, 0.0 }
 0x122   : > { %514 = vadd.xlane.f32.xlu2 %v513_v44 }
 0x187   : > { %v506_v49 = vpop.xlane.xlu0 %505 }
 0x188   : > { %881 = vrcp.f32 %v506_v49 }
 0x18d   : > { %v512_v50 = vpop.xlane.xlu2 %511 }
 0x18e   : > { %v882_v51 = vpop.eup %881  ;;  %883 = vrcp.f32 %v512_v50 }
 0x18f   : > { %v520_v52 = vmul.f32 %v882_v51, %v874_v33  ;;  %v509_v53 = vpop.xlane.xlu1 %508 }
 0x190   : > { %885 = vrcp.f32 %v509_v53 }
 0x191   : > { %851 = vmatmul.msk.f32.vlgmr.msrb.gmra.mxu0 %vm364_vm0, %v520_v52 }
 0x194   : > { %v884_v54 = vpop.eup %883 }
 0x195   : > { %v515_v55 = vpop.xlane.xlu2 %514  ;;  %v522_v56 = vmul.f32 %v884_v54, %v876_v38 }
 0x196   : > { %v886_v57 = vpop.eup %885  ;;  %887 = vrcp.f32 %v515_v55 }
 0x197   : > { %v521_v58 = vmul.f32 %v886_v57, %v878_v41  ;;  %853 = vmatmul.msk.f32.vlgmr.msrb.gmra.mxu2 %vm364_vm0, %v522_v56 }
 0x199   : > { %852 = vmatmul.msk.f32.vlgmr.msrb.gmra.mxu1 %vm364_vm0, %v521_v58 }
 0x19c   : > { %v888_v59 = vpop.eup %887 }
 0x19d   : > { %v523_v60 = vmul.f32 %v888_v59, %v880_v43 }
 0x19f   : > { %854 = vmatmul.msk.f32.vlgmr.msrb.gmra.mxu3 %vm364_vm0, %v523_v60 }
 0x20e   : > { %v544_v1 = vpop.f32.mrf.mxu0 }
 0x20f   : > { %855 = vmatmul.msk.f32.vlgmr.msra.gmra.mxu0 %vm364_vm0, %v544_v1 }
 0x216   : > { %v567_v2 = vpop.f32.mrf.mxu1 }
 0x217   : > { %856 = vmatmul.msk.f32.vlgmr.msra.gmra.mxu1 %vm364_vm0, %v567_v2 }
 0x21a   : > { %v590_v3 = vpop.f32.mrf.mxu2 }
 0x21b   : > { %857 = vmatmul.msk.f32.vlgmr.msra.gmra.mxu2 %vm364_vm0, %v590_v3 }
 0x222   : > { %v613_v4 = vpop.f32.mrf.mxu3 }
 0x223   : > { %858 = vmatmul.msk.f32.vlgmr.msra.gmra.mxu3 %vm364_vm0, %v613_v4 }
 0x28c   : > { %v640_v6 = vpop.f32.mrf.mxu0 }
 0x28d   : > { %v713_v9 = vsel %vm712_vm2, %v640_v6, 0.0 }
 0x294   : > { %v663_v5 = vpop.f32.mrf.mxu1 }
 0x295   : > { %v714_v8 = vsel %vm712_vm2, %v663_v5, 0.0 }
 0x296   : > { %v715_v11 = vadd.f32 %v714_v8, %v713_v9 }
 0x29e   : > { %v686_v7 = vpop.f32.mrf.mxu2 }
 0x29f   : > { %v716_v10 = vsel %vm712_vm2, %v686_v7, 0.0 }
 0x2a0   : > { %v717_v12 = vadd.f32 %v716_v10, %v715_v11 }
 0x2a6   : > { %v709_v13 = vpop.f32.mrf.mxu3 }
 0x2a7   : > { %v718_v15 = vsel %vm712_vm2, %v709_v13, 0.0 }
 0x2a8   : > { %v719_v16 = vadd.f32 %v718_v15, %v717_v12 }
 0x2aa   : > { %v724_v18 = vadd.f32 %v872_v14, %v719_v16 }
 0x2ac   : > { %v726_v19 = vadd.f32 %v725_v17, %v724_v18 }
 0x2ae   : > { %727 = vst.msk [vmem:[%s350_s11] sm:$0xff] %vm712_vm2, %v726_v19 }
 0x2af PF: > { %s17_s24 = sadd.s32 1, %s895_s24  }
 0x2b0   : > { %p14_p4 = scmp.ge.s32.totalorder %s17_s24, 4  }
 0x2b2   :  { %16 = sbr.rel (!%p14_p4) target bundleno = 1 (0x1), region = 90 }

// kernel: decoder_forward.25
= control target key start
LH: loop header
LB: loop body
LE: loop exit
PB: predicated region body
PF: predicated region fallthrough
CT: control target
= control target key end

     0   :  { %s255_s0 = inlined_call_operand.<no memory space> [shape: f32[1,1], index: 0, kind: input, shape index: {}]   ;;  %s256_s2 = inlined_call_operand.vmem [shape: f32[16,32], index: 2, kind: input, shape index: {}]   ;;  %s257_s3 = inlined_call_operand.hbm [shape: f32[16,32], index: 3, kind: output, shape index: {}]   ;;  %s258_s1 = inlined_call_operand.<no memory space> [shape: f32[1,1], index: 1, kind: input, shape index: {}]  }
   0x1   :  { %v8_v0 = vstv %s255_s0  ;;  %v10_v1 = vstv %s258_s1 }
   0x2   :  { %9 = vst [vmem:[#allocation2] sm:$0x1] %v8_v0 }
   0x3   :  { %11 = vst [vmem:[#allocation3] sm:$0x1] %v10_v1 }
   0x4   :  { %v19_v2 = vld [vmem:[%s256_s2] sm:$0xff]  ;;  %vm23_vm0 = vcmask 261120   ;;  %v198_v4 = vmov 0  }
   0x5   :  { %v24_v3 = vsel %vm23_vm0, %v19_v2, 0.0  ;;  %156 = vset.pattern.permute.xlu2 %v198_v4  ;;  %157 = vset.pattern.permute.xlu0 %v198_v4 }
   0x6   :  { %25 = vadd.xlane.f32.xlu0 %v24_v3 }
   0x9   :  { %v158_v5 = vld [vmem:[#allocation2] ss:$0 sm:$0xff] }
   0xa   :  { %12 = vsyncpa [#allocation5], 0  ;;  %61 = vperm.xlu2 %156, %v158_v5   ;;  %v20_v6 = vld [vmem:[%s256_s2 + $0x8] sm:$0xff]  ;;  %v199_v8 = vmov 32.0   ;;  %v159_v11 = vld [vmem:[#allocation3] ss:$0 sm:$0xff] }
   0xb   :  { %v27_v7 = vsel %vm23_vm0, %v20_v6, 0.0  ;;  %160 = vrcp.f32 %v199_v8  ;;  %v200_v26 = vmov 31.0   ;;  %s201_s1 = smov [#allocation4]   ;;  %s138_s21 = sshll.u32 %s257_s3, 4  ;;  %s139_s21 = int_to_ptr.hbm [resolvable:$true] %s138_s21 }
   0xc   :  { %162 = vrcp.f32 %v200_v26  ;;  %s136_s2 = sshll.u32 %s201_s1, 4  ;;  %s202_s22 = smov 128   ;;  %s137_s2 = int_to_ptr.vmem [resolvable:$true] %s136_s2 }
   0xd   :  { %s203_s23 = smov 8  }
   0xe   :  { %28 = vadd.xlane.f32.xlu0 %v27_v7 }
  0x11   :  { %v161_v9 = vpop.eup %160 }
  0x12   :  { %v31_v10 = vmul.f32 32.0, %v161_v9  ;;  %125 = vperm.xlu2 %156, %v159_v11   ;;  %vm35_vm1 = vweird.f32 %v161_v9  ;;  %v163_v27 = vpop.eup %162 }
  0x13   :  { %v50_v28 = vmul.f32 31.0, %v163_v27  ;;  %vm54_vm2 = vweird.f32 %v163_v27 }
  0x14   :  { %v32_v12 = vsub.f32 1.0, %v31_v10 }
  0x15   :  { %v51_v29 = vsub.f32 1.0, %v50_v28 }
  0x16   :  { %v33_v13 = vmul.f32 %v161_v9, %v32_v12 }
  0x17   :  { %v52_v30 = vmul.f32 %v163_v27, %v51_v29 }
  0x18   :  { %v34_v14 = vadd.f32 %v161_v9, %v33_v13 }
  0x19   :  { %v53_v31 = vadd.f32 %v163_v27, %v52_v30 }
  0x1a   :  { %v36_v15 = vsel %vm35_vm1, %v161_v9, %v34_v14 }
  0x1b   :  { %v55_v32 = vsel %vm54_vm2, %v163_v27, %v53_v31 }
  0x64   :  { %v62_v61 = vpop.permute.xlu2 %61 }
  0x6c   :  { %v126_v8 = vpop.permute.xlu2 %125 }
  0x79   :  { %v26_v16 = vpop.xlane.xlu0 %25 }
  0x7a   :  { %v37_v17 = vmul.f32 %v36_v15, %v26_v16 }
  0x7c   :  { %v238_v18 = vsub.f32 %v19_v2, %v37_v17 }
  0x7e   :  { %v41_v19 = vmul.f32 %v238_v18, %v238_v18  ;;  %v64_v5 = vmul.f32 %v62_v61, %v238_v18 }
  0x80   :  { %v43_v20 = vsel %vm23_vm0, %v41_v19, 0.0 }
  0x81   :  { %44 = vadd.xlane.f32.xlu1 %v43_v20  ;;  %v29_v21 = vpop.xlane.xlu0 %28 }
  0x82   :  { %v38_v22 = vmul.f32 %v36_v15, %v29_v21 }
  0x84   :  { %v243_v23 = vsub.f32 %v20_v6, %v38_v22 }
  0x86   :  { %v42_v24 = vmul.f32 %v243_v23, %v243_v23  ;;  %v65_v18 = vmul.f32 %v62_v61, %v243_v23 }
  0x88   :  { %v46_v25 = vsel %vm23_vm0, %v42_v24, 0.0 }
  0x89   :  { %47 = vadd.xlane.f32.xlu1 %v46_v25 }
  0xf4   :  { %v45_v33 = vpop.xlane.xlu1 %44 }
  0xf5   :  { %v56_v34 = vmul.f32 %v55_v32, %v45_v33 }
  0xf7   :  { %164 = vrsqrt.f32 %v56_v34  ;;  %vm73_vm3 = vcmp.eq.f32.partialorder %v56_v34, inf  ;;  %v76_v47 = vand.u32 2147483648, %v56_v34  ;;  %vm75_vm4 = vcmp.eq.f32.partialorder %v56_v34, 0.0 }
  0xfc   :  { %v48_v35 = vpop.xlane.xlu1 %47 }
  0xfd   :  { %v165_v36 = vpop.eup %164  ;;  %v57_v37 = vmul.f32 %v55_v32, %v48_v35 }
  0xfe   :  { %v67_v38 = vmul.f32 %v165_v36, %v56_v34 }
  0xff   :  { %166 = vrsqrt.f32 %v57_v37  ;;  %vm85_vm5 = vcmp.eq.f32.partialorder %v57_v37, inf  ;;  %v88_v55 = vand.u32 2147483648, %v57_v37  ;;  %vm87_vm6 = vcmp.eq.f32.partialorder %v57_v37, 0.0 }
 0x100   :  { %v68_v39 = vmul.f32 %v165_v36, %v67_v38 }
 0x102   :  { %v69_v40 = vmul.f32 0.5, %v68_v39 }
 0x104   :  { %v70_v41 = vsub.f32 1.5, %v69_v40 }
 0x105   :  { %v167_v42 = vpop.eup %166 }
 0x106   :  { %v71_v43 = vmul.f32 %v165_v36, %v70_v41  ;;  %v79_v44 = vmul.f32 %v167_v42, %v57_v37 }
 0x108   :  { %v72_v45 = vmul.f32 %v71_v43, %v56_v34  ;;  %v80_v46 = vmul.f32 %v167_v42, %v79_v44 }
 0x10a   :  { %v81_v48 = vmul.f32 0.5, %v80_v46  ;;  %v74_v49 = vsel %vm73_vm3, %v56_v34, %v72_v45 }
 0x10b   :  { %v77_v50 = vsel %vm75_vm4, %v76_v47, %v74_v49 }
 0x10c   :  { %v82_v51 = vsub.f32 1.5, %v81_v48  ;;  %v90_v52 = vadd.f32 1e-06, %v77_v50 }
 0x10e   :  { %v83_v53 = vmul.f32 %v167_v42, %v82_v51  ;;  %168 = vrcp.f32 %v90_v52  ;;  %v103_v63 = vand.u32 2147483648, %v90_v52  ;;  %v101_v1 = vand.u32 2147483647, %v90_v52 }
 0x10f   :  { %vm97_vm8 = vweird.f32 %v90_v52 }
 0x110   :  { %v84_v54 = vmul.f32 %v83_v53, %v57_v37  ;;  %v104_v4 = vor.u32 1.1754944e-38, %v103_v63  ;;  %vm102_vm10 = vcmp.eq.f32.partialorder %v101_v1, 8.507059e+37 }
 0x112   :  { %v86_v56 = vsel %vm85_vm5, %v57_v37, %v84_v54 }
 0x113   :  { %v89_v57 = vsel %vm87_vm6, %v88_v55, %v86_v56 }
 0x114   :  { %v169_v58 = vpop.eup %168  ;;  %v91_v59 = vadd.f32 1e-06, %v89_v57 }
 0x115   :  { %v93_v60 = vmul.f32 %v169_v58, %v90_v52  ;;  %vm98_vm7 = vweird.f32 %v169_v58 }
 0x116   :  { %170 = vrcp.f32 %v91_v59  ;;  %vm99_vm9 = vmor %vm97_vm8, %vm98_vm7  ;;  %v118_v12 = vand.u32 2147483648, %v91_v59  ;;  %v116_v14 = vand.u32 2147483647, %v91_v59  ;;  %vm112_vm12 = vweird.f32 %v91_v59 }
 0x117   :  { %v94_v62 = vsub.f32 1.0, %v93_v60 }
 0x118   :  { %v119_v17 = vor.u32 1.1754944e-38, %v118_v12  ;;  %vm117_vm14 = vcmp.eq.f32.partialorder %v116_v14, 8.507059e+37 }
 0x119   :  { %v95_v0 = vmul.f32 %v169_v58, %v94_v62 }
 0x11b   :  { %v96_v2 = vadd.f32 %v169_v58, %v95_v0 }
 0x11c   :  { %v171_v3 = vpop.eup %170 }
 0x11d   :  { %v100_v6 = vsel %vm99_vm9, %v169_v58, %v96_v2  ;;  %v108_v7 = vmul.f32 %v171_v3, %v91_v59  ;;  %vm113_vm11 = vweird.f32 %v171_v3 }
 0x11e   :  { %v105_v9 = vsel %vm102_vm10, %v104_v4, %v100_v6  ;;  %vm114_vm13 = vmor %vm112_vm12, %vm113_vm11 }
 0x11f   :  { %v106_v10 = vmul.f32 %v105_v9, %v64_v5  ;;  %v109_v11 = vsub.f32 1.0, %v108_v7 }
 0x121   :  { %v110_v13 = vmul.f32 %v171_v3, %v109_v11  ;;  %v128_v15 = vadd.f32 %v126_v8, %v106_v10 }
 0x123   :  { %v111_v16 = vadd.f32 %v171_v3, %v110_v13  ;;  %130 = vst.msk [vmem:[#allocation4] sm:$0xff] %vm23_vm0, %v128_v15 }
 0x125   :  { %v115_v19 = vsel %vm114_vm13, %v171_v3, %v111_v16 }
 0x126   :  { %v120_v20 = vsel %vm117_vm14, %v119_v17, %v115_v19 }
 0x127   :  { %v121_v21 = vmul.f32 %v120_v20, %v65_v18 }
 0x129   :  { %v129_v22 = vadd.f32 %v126_v8, %v121_v21 }
 0x12b   :  { %131 = vst.msk [vmem:[#allocation4 + $0x8] sm:$0xff] %vm23_vm0, %v129_v22 }
 0x12c   :  { %144 = dma.vmem_to_hbm [thread:$0]  %s137_s2, 256, %s139_s21, [#allocation5], %s202_s22, %s202_s22, %s203_s23  }
 0x12d   :  { %196 = dma.done.wait [#allocation5], 256  }
 0x12e   :  { %197 = vsyncadd [#allocation5], 4294967040 }
 0x12f   :  { %149 = vsyncpa [#allocation5], 1 }

// kernel: decoder_forward.19
= control target key start
LH: loop header
LB: loop body
LE: loop exit
PB: predicated region body
PF: predicated region fallthrough
CT: control target
= control target key end

     0   :  { %vm28_vm0 = vcmask 261120   ;;  %v205_v1 = vmov 0   ;;  %v206_v7 = vmov 32.0   ;;  %v207_v26 = vmov 31.0   ;;  %s287_s2 = inlined_call_operand.vmem [shape: f32[16,32], index: 2, kind: input, shape index: {}]   ;;  %s288_s0 = inlined_call_operand.<no memory space> [shape: f32[1,1], index: 0, kind: input, shape index: {}]   ;;  %s289_s1 = inlined_call_operand.<no memory space> [shape: f32[1,1], index: 1, kind: input, shape index: {}]   ;;  %s290_s4 = inlined_call_operand.vmem [shape: f32[1,96], index: 4, kind: input, shape index: {}]   ;;  %s291_s3 = inlined_call_operand.vmem [shape: f32[32,96], index: 3, kind: input, shape index: {}]   ;;  %s292_s5 = inlined_call_operand.vmem [shape: f32[16,96], index: 5, kind: output, shape index: {}]  }
   0x1   :  { %v24_v0 = vld [vmem:[%s287_s2] sm:$0xff]  ;;  %188 = vset.pattern.permute.xlu2 %v205_v1  ;;  %v10_v2 = vstv %s288_s0  ;;  %189 = vset.pattern.permute.xlu0 %v205_v1  ;;  %v25_v4 = vld [vmem:[%s287_s2 + $0x8] sm:$0xff]  ;;  %193 = vrcp.f32 %v206_v7  ;;  %v12_v10 = vstv %s289_s1  ;;  %vm172_vm15 = vcmask 785408  }
   0x2   :  { %v29_v3 = vsel %vm28_vm0, %v24_v0, 0.0  ;;  %11 = vst [vmem:[#allocation2] sm:$0x1] %v10_v2  ;;  %v32_v5 = vsel %vm28_vm0, %v25_v4, 0.0  ;;  %195 = vrcp.f32 %v207_v26  ;;  %v138_v32 = vld [vmem:[%s291_s3 + $0x18] sm:$0xff]  ;;  %v137_v33 = vld [vmem:[%s291_s3 + $0x10] sm:$0xff] }
   0x3   :  { %30 = vadd.xlane.f32.xlu0 %v29_v3  ;;  %13 = vst [vmem:[#allocation3] sm:$0x1] %v12_v10  ;;  %161 = vmatpush.msra.mxu0 %v138_v32  ;;  %v136_v35 = vld [vmem:[%s291_s3 + $0x8] sm:$0xff]  ;;  %v135_v44 = vld [vmem:[%s291_s3] sm:$0xff] }
   0x4   :  { %181 = vmatpush.msra.mxu1 %v138_v32 }
   0x5   :  { %162 = vmatpush.msra.mxu0 %v137_v33 }
   0x6   :  { %182 = vmatpush.msra.mxu1 %v137_v33 }
   0x7   :  { %v194_v8 = vpop.eup %193  ;;  %163 = vmatpush.msra.mxu0 %v136_v35 }
   0x8   :  { %v36_v9 = vmul.f32 32.0, %v194_v8  ;;  %vm40_vm1 = vweird.f32 %v194_v8  ;;  %v196_v27 = vpop.eup %195  ;;  %183 = vmatpush.msra.mxu1 %v136_v35 }
   0x9   :  { %v190_v6 = vld [vmem:[#allocation2] ss:$0 sm:$0xff]  ;;  %v55_v28 = vmul.f32 31.0, %v196_v27  ;;  %vm59_vm2 = vweird.f32 %v196_v27  ;;  %164 = vmatpush.msra.mxu0 %v135_v44 }
   0xa   :  { %66 = vperm.xlu2 %188, %v190_v6   ;;  %v37_v11 = vsub.f32 1.0, %v36_v9  ;;  %v191_v13 = vld [vmem:[#allocation3] ss:$0 sm:$0xff]  ;;  %184 = vmatpush.msra.mxu1 %v135_v44 }
   0xb   :  { %33 = vadd.xlane.f32.xlu0 %v32_v5  ;;  %v56_v29 = vsub.f32 1.0, %v55_v28  ;;  %v192_v28 = vld [vmem:[%s290_s4] ss:$0 sm:$0xff] }
   0xc   :  { %v38_v12 = vmul.f32 %v194_v8, %v37_v11 }
   0xd   :  { %v57_v30 = vmul.f32 %v196_v27, %v56_v29 }
   0xe   :  { %v39_v14 = vadd.f32 %v194_v8, %v38_v12 }
   0xf   :  { %v58_v31 = vadd.f32 %v196_v27, %v57_v30 }
  0x10   :  { %v41_v15 = vsel %vm40_vm1, %v194_v8, %v39_v14 }
  0x11   :  { %v60_v34 = vsel %vm59_vm2, %v196_v27, %v58_v31 }
  0x12   :  { %130 = vperm.xlu2 %188, %v191_v13  }
  0x64   :  { %v67_v1 = vpop.permute.xlu2 %66 }
  0x6c   :  { %v131_v13 = vpop.permute.xlu2 %130 }
  0x76   :  { %v31_v16 = vpop.xlane.xlu0 %30 }
  0x77   :  { %v42_v17 = vmul.f32 %v41_v15, %v31_v16 }
  0x79   :  { %v252_v18 = vsub.f32 %v24_v0, %v42_v17 }
  0x7b   :  { %v46_v19 = vmul.f32 %v252_v18, %v252_v18  ;;  %v69_v9 = vmul.f32 %v67_v1, %v252_v18 }
  0x7d   :  { %v48_v20 = vsel %vm28_vm0, %v46_v19, 0.0 }
  0x7e   :  { %49 = vadd.xlane.f32.xlu1 %v48_v20  ;;  %v34_v21 = vpop.xlane.xlu0 %33 }
  0x7f   :  { %v43_v22 = vmul.f32 %v41_v15, %v34_v21 }
  0x81   :  { %v257_v23 = vsub.f32 %v25_v4, %v43_v22 }
  0x83   :  { %v47_v24 = vmul.f32 %v257_v23, %v257_v23  ;;  %v70_v18 = vmul.f32 %v67_v1, %v257_v23 }
  0x85   :  { %v51_v25 = vsel %vm28_vm0, %v47_v24, 0.0 }
  0x86   :  { %52 = vadd.xlane.f32.xlu1 %v51_v25 }
  0xf1   :  { %v50_v36 = vpop.xlane.xlu1 %49 }
  0xf2   :  { %v61_v37 = vmul.f32 %v60_v34, %v50_v36 }
  0xf4   :  { %197 = vrsqrt.f32 %v61_v37  ;;  %vm78_vm3 = vcmp.eq.f32.partialorder %v61_v37, inf  ;;  %v81_v51 = vand.u32 2147483648, %v61_v37  ;;  %vm80_vm4 = vcmp.eq.f32.partialorder %v61_v37, 0.0 }
  0xf9   :  { %v53_v38 = vpop.xlane.xlu1 %52 }
  0xfa   :  { %v198_v39 = vpop.eup %197  ;;  %v62_v40 = vmul.f32 %v60_v34, %v53_v38 }
  0xfb   :  { %v72_v41 = vmul.f32 %v198_v39, %v61_v37 }
  0xfc   :  { %199 = vrsqrt.f32 %v62_v40  ;;  %vm90_vm5 = vcmp.eq.f32.partialorder %v62_v40, inf  ;;  %v93_v59 = vand.u32 2147483648, %v62_v40  ;;  %vm92_vm6 = vcmp.eq.f32.partialorder %v62_v40, 0.0 }
  0xfd   :  { %v73_v42 = vmul.f32 %v198_v39, %v72_v41 }
  0xff   :  { %v74_v43 = vmul.f32 0.5, %v73_v42 }
 0x101   :  { %v75_v45 = vsub.f32 1.5, %v74_v43 }
 0x102   :  { %v200_v46 = vpop.eup %199 }
 0x103   :  { %v76_v47 = vmul.f32 %v198_v39, %v75_v45  ;;  %v84_v48 = vmul.f32 %v200_v46, %v62_v40 }
 0x105   :  { %v77_v49 = vmul.f32 %v76_v47, %v61_v37  ;;  %v85_v50 = vmul.f32 %v200_v46, %v84_v48 }
 0x107   :  { %v86_v52 = vmul.f32 0.5, %v85_v50  ;;  %v79_v53 = vsel %vm78_vm3, %v61_v37, %v77_v49 }
 0x108   :  { %v82_v54 = vsel %vm80_vm4, %v81_v51, %v79_v53 }
 0x109   :  { %v87_v55 = vsub.f32 1.5, %v86_v52  ;;  %v95_v56 = vadd.f32 1e-06, %v82_v54 }
 0x10b   :  { %v88_v57 = vmul.f32 %v200_v46, %v87_v55  ;;  %201 = vrcp.f32 %v95_v56  ;;  %v108_v3 = vand.u32 2147483648, %v95_v56  ;;  %v106_v5 = vand.u32 2147483647, %v95_v56 }
 0x10c   :  { %vm102_vm8 = vweird.f32 %v95_v56 }
 0x10d   :  { %v89_v58 = vmul.f32 %v88_v57, %v62_v40  ;;  %v109_v8 = vor.u32 1.1754944e-38, %v108_v3  ;;  %vm107_vm10 = vcmp.eq.f32.partialorder %v106_v5, 8.507059e+37 }
 0x10f   :  { %v91_v60 = vsel %vm90_vm5, %v62_v40, %v89_v58 }
 0x110   :  { %v94_v61 = vsel %vm92_vm6, %v93_v59, %v91_v60 }
 0x111   :  { %v202_v62 = vpop.eup %201  ;;  %v96_v63 = vadd.f32 1e-06, %v94_v61 }
 0x112   :  { %v98_v0 = vmul.f32 %v202_v62, %v95_v56  ;;  %vm103_vm7 = vweird.f32 %v202_v62 }
 0x113   :  { %203 = vrcp.f32 %v96_v63  ;;  %vm104_vm9 = vmor %vm102_vm8, %vm103_vm7  ;;  %v123_v16 = vand.u32 2147483648, %v96_v63  ;;  %v121_v19 = vand.u32 2147483647, %v96_v63  ;;  %vm117_vm12 = vweird.f32 %v96_v63 }
 0x114   :  { %v99_v2 = vsub.f32 1.0, %v98_v0 }
 0x115   :  { %v124_v22 = vor.u32 1.1754944e-38, %v123_v16  ;;  %vm122_vm14 = vcmp.eq.f32.partialorder %v121_v19, 8.507059e+37 }
 0x116   :  { %v100_v4 = vmul.f32 %v202_v62, %v99_v2 }
 0x118   :  { %v101_v6 = vadd.f32 %v202_v62, %v100_v4 }
 0x119   :  { %v204_v7 = vpop.eup %203 }
 0x11a   :  { %v105_v10 = vsel %vm104_vm9, %v202_v62, %v101_v6  ;;  %v113_v11 = vmul.f32 %v204_v7, %v96_v63  ;;  %vm118_vm11 = vweird.f32 %v204_v7 }
 0x11b   :  { %v110_v12 = vsel %vm107_vm10, %v109_v8, %v105_v10  ;;  %vm119_vm13 = vmor %vm117_vm12, %vm118_vm11 }
 0x11c   :  { %v111_v14 = vmul.f32 %v110_v12, %v69_v9  ;;  %v114_v15 = vsub.f32 1.0, %v113_v11 }
 0x11e   :  { %v115_v17 = vmul.f32 %v204_v7, %v114_v15  ;;  %v133_v20 = vadd.f32 %v131_v13, %v111_v14 }
 0x120   :  { %v116_v21 = vadd.f32 %v204_v7, %v115_v17  ;;  %179 = vmatmul.msk.f32.vlgmr.msra.gmra.mxu0 %vm28_vm0, %v133_v20 }
 0x122   :  { %v120_v24 = vsel %vm119_vm13, %v204_v7, %v116_v21 }
 0x123   :  { %v125_v25 = vsel %vm122_vm14, %v124_v22, %v120_v24 }
 0x124   :  { %v126_v26 = vmul.f32 %v125_v25, %v70_v18 }
 0x126   :  { %v134_v27 = vadd.f32 %v131_v13, %v126_v26 }
 0x128   :  { %180 = vmatmul.msk.f32.vlgmr.msra.gmra.mxu1 %vm28_vm0, %v134_v27 }
 0x19d   :  { %v166_v29 = vpop.f32.mrf.mxu0 }
 0x19e   :  { %v167_v30 = vadd.f32 %v192_v28, %v166_v29 }
 0x1a0   :  { %173 = vst.msk [vmem:[%s292_s5] sm:$0xff] %vm172_vm15, %v167_v30 }
 0x1a5   :  { %v169_v31 = vpop.f32.mrf.mxu1 }
 0x1a6   :  { %v170_v23 = vadd.f32 %v192_v28, %v169_v31 }
 0x1a8   :  { %174 = vst.msk [vmem:[%s292_s5 + $0x8] sm:$0xff] %vm172_vm15, %v170_v23 }

// kernel: decoder_forward.18
= control target key start
LH: loop header
LB: loop body
LE: loop exit
PB: predicated region body
PF: predicated region fallthrough
CT: control target
= control target key end

     0   :  { %vm34_vm0 = vcmask 261120   ;;  %v267_v1 = vmov 0   ;;  %v268_v7 = vmov 32.0   ;;  %v269_v26 = vmov 31.0   ;;  %s398_s2 = inlined_call_operand.vmem [shape: f32[16,32], index: 2, kind: input, shape index: {}]   ;;  %s399_s0 = inlined_call_operand.<no memory space> [shape: f32[1,1], index: 0, kind: input, shape index: {}]   ;;  %s400_s1 = inlined_call_operand.<no memory space> [shape: f32[1,1], index: 1, kind: input, shape index: {}]   ;;  %s401_s4 = inlined_call_operand.vmem [shape: f32[1,64], index: 4, kind: input, shape index: {}]   ;;  %s402_s3 = inlined_call_operand.vmem [shape: f32[32,64], index: 3, kind: input, shape index: {}]   ;;  %s403_s5 = inlined_call_operand.vmem [shape: f32[64,32], index: 5, kind: input, shape index: {}]   ;;  %s404_s6 = inlined_call_operand.vmem [shape: f32[1,32], index: 6, kind: input, shape index: {}]   ;;  %s405_s7 = inlined_call_operand.vmem [shape: f32[16,32], index: 7, kind: output, shape index: {}]  }
   0x1   :  { %v313_v0 = vld [vmem:[%s398_s2 + $0x8] sm:$0xff]  ;;  %249 = vset.pattern.permute.xlu2 %v267_v1  ;;  %v12_v2 = vstv %s399_s0  ;;  %250 = vset.pattern.permute.xlu0 %v267_v1  ;;  %v323_v4 = vld [vmem:[%s398_s2] sm:$0xff]  ;;  %255 = vrcp.f32 %v268_v7  ;;  %v14_v10 = vstv %s400_s1  ;;  %vm192_vm15 = vcmask 523264  }
   0x2   :  { %v38_v3 = vsel %vm34_vm0, %v313_v0, 0.0  ;;  %13 = vst [vmem:[#allocation2] sm:$0x1] %v12_v2  ;;  %v35_v5 = vsel %vm34_vm0, %v323_v4, 0.0  ;;  %257 = vrcp.f32 %v269_v26  ;;  %v144_v36 = vld [vmem:[%s402_s3 + $0x18] sm:$0xff]  ;;  %v143_v40 = vld [vmem:[%s402_s3 + $0x10] sm:$0xff] }
   0x3   :  { %39 = vadd.xlane.f32.xlu0 %v38_v3  ;;  %15 = vst [vmem:[#allocation3] sm:$0x1] %v14_v10  ;;  %234 = vmatpush.msra.mxu3 %v144_v36  ;;  %v142_v42 = vld [vmem:[%s402_s3 + $0x8] sm:$0xff]  ;;  %v141_v44 = vld [vmem:[%s402_s3] sm:$0xff]  ;;  %v187_v55 = vld [vmem:[%s403_s5 + $0x38] sm:$0xff] }
   0x4   :  { %167 = vmatpush.msra.mxu0 %v144_v36  ;;  %v186_v56 = vld [vmem:[%s403_s5 + $0x30] sm:$0xff]  ;;  %238 = vmatpush.msra.mxu2 %v187_v55  ;;  %v185_v59 = vld [vmem:[%s403_s5 + $0x28] sm:$0xff]  ;;  %v184_v61 = vld [vmem:[%s403_s5 + $0x20] sm:$0xff] }
   0x5   :  { %235 = vmatpush.msra.mxu3 %v143_v40  ;;  %207 = vmatpush.msra.mxu1 %v187_v55  ;;  %v183_v1 = vld [vmem:[%s403_s5 + $0x18] sm:$0xff]  ;;  %v181_v36 = vld [vmem:[%s403_s5 + $0x8] sm:$0xff] }
   0x6   :  { %168 = vmatpush.msra.mxu0 %v143_v40  ;;  %239 = vmatpush.msra.mxu2 %v186_v56 }
   0x7   :  { %v256_v8 = vpop.eup %255  ;;  %236 = vmatpush.msra.mxu3 %v142_v42  ;;  %208 = vmatpush.msra.mxu1 %v186_v56 }
   0x8   :  { %v42_v9 = vmul.f32 32.0, %v256_v8  ;;  %vm46_vm1 = vweird.f32 %v256_v8  ;;  %v258_v27 = vpop.eup %257  ;;  %169 = vmatpush.msra.mxu0 %v142_v42  ;;  %240 = vmatpush.msra.mxu2 %v185_v59 }
   0x9   :  { %v251_v6 = vld [vmem:[#allocation2] ss:$0 sm:$0xff]  ;;  %v61_v28 = vmul.f32 31.0, %v258_v27  ;;  %vm65_vm2 = vweird.f32 %v258_v27  ;;  %237 = vmatpush.msra.mxu3 %v141_v44  ;;  %209 = vmatpush.msra.mxu1 %v185_v59 }
   0xa   :  { %72 = vperm.xlu2 %249, %v251_v6   ;;  %v43_v11 = vsub.f32 1.0, %v42_v9  ;;  %v252_v13 = vld [vmem:[#allocation3] ss:$0 sm:$0xff]  ;;  %170 = vmatpush.msra.mxu0 %v141_v44  ;;  %v254_v44 = vld [vmem:[%s404_s6] ss:$0 sm:$0xff] }
   0xb   :  { %36 = vadd.xlane.f32.xlu0 %v35_v5  ;;  %v62_v29 = vsub.f32 1.0, %v61_v28  ;;  %241 = vmatpush.msra.mxu2 %v184_v61 }
   0xc   :  { %v44_v12 = vmul.f32 %v256_v8, %v43_v11  ;;  %210 = vmatpush.msra.mxu1 %v184_v61 }
   0xd   :  { %v63_v30 = vmul.f32 %v258_v27, %v62_v29  ;;  %242 = vmatpush.msra.mxu2 %v183_v1 }
   0xe   :  { %v45_v14 = vadd.f32 %v256_v8, %v44_v12  ;;  %211 = vmatpush.msra.mxu1 %v183_v1 }
   0xf   :  { %v64_v31 = vadd.f32 %v258_v27, %v63_v30 }
  0x10   :  { %v47_v15 = vsel %vm46_vm1, %v256_v8, %v45_v14 }
  0x11   :  { %v66_v32 = vsel %vm65_vm2, %v258_v27, %v64_v31 }
  0x12   :  { %136 = vperm.xlu2 %249, %v252_v13  }
  0x64   :  { %v73_v9 = vpop.permute.xlu2 %72 }
  0x76   :  { %v40_v16 = vpop.xlane.xlu0 %39 }
  0x77   :  { %v49_v17 = vmul.f32 %v47_v15, %v40_v16 }
  0x79   :  { %v331_v18 = vsub.f32 %v313_v0, %v49_v17 }
  0x7b   :  { %v53_v19 = vmul.f32 %v331_v18, %v331_v18  ;;  %v76_v16 = vmul.f32 %v73_v9, %v331_v18 }
  0x7d   :  { %v57_v20 = vsel %vm34_vm0, %v53_v19, 0.0 }
  0x7e   :  { %58 = vadd.xlane.f32.xlu1 %v57_v20  ;;  %v37_v21 = vpop.xlane.xlu0 %36 }
  0x7f   :  { %v48_v22 = vmul.f32 %v47_v15, %v37_v21 }
  0x81   :  { %v337_v23 = vsub.f32 %v323_v4, %v48_v22 }
  0x83   :  { %v52_v24 = vmul.f32 %v337_v23, %v337_v23  ;;  %v75_v18 = vmul.f32 %v73_v9, %v337_v23  ;;  %v180_v23 = vld [vmem:[%s403_s5] sm:$0xff] }
  0x85   :  { %v54_v25 = vsel %vm34_vm0, %v52_v24, 0.0 }
  0x86   :  { %55 = vadd.xlane.f32.xlu1 %v54_v25  ;;  %v137_v25 = vpop.permute.xlu2 %136 }
  0xf1   :  { %v59_v33 = vpop.xlane.xlu1 %58 }
  0xf2   :  { %v68_v34 = vmul.f32 %v66_v32, %v59_v33 }
  0xf4   :  { %259 = vrsqrt.f32 %v68_v34  ;;  %vm96_vm3 = vcmp.eq.f32.partialorder %v68_v34, inf  ;;  %v99_v51 = vand.u32 2147483648, %v68_v34  ;;  %vm98_vm4 = vcmp.eq.f32.partialorder %v68_v34, 0.0 }
  0xf9   :  { %v56_v35 = vpop.xlane.xlu1 %55 }
  0xfa   :  { %v260_v37 = vpop.eup %259  ;;  %v67_v38 = vmul.f32 %v66_v32, %v56_v35  ;;  %v182_v35 = vld [vmem:[%s403_s5 + $0x10] sm:$0xff] }
  0xfb   :  { %v90_v39 = vmul.f32 %v260_v37, %v68_v34  ;;  %243 = vmatpush.msra.mxu2 %v182_v35  ;;  %212 = vmatpush.msra.mxu1 %v182_v35 }
  0xfc   :  { %261 = vrsqrt.f32 %v67_v38  ;;  %vm84_vm5 = vcmp.eq.f32.partialorder %v67_v38, inf  ;;  %v87_v63 = vand.u32 2147483648, %v67_v38  ;;  %vm86_vm6 = vcmp.eq.f32.partialorder %v67_v38, 0.0 }
  0xfd   :  { %v91_v41 = vmul.f32 %v260_v37, %v90_v39  ;;  %244 = vmatpush.msra.mxu2 %v181_v36  ;;  %213 = vmatpush.msra.mxu1 %v181_v36 }
  0xff   :  { %v92_v43 = vmul.f32 0.5, %v91_v41  ;;  %245 = vmatpush.msra.mxu2 %v180_v23  ;;  %214 = vmatpush.msra.mxu1 %v180_v23 }
 0x101   :  { %v93_v45 = vsub.f32 1.5, %v92_v43 }
 0x102   :  { %v262_v46 = vpop.eup %261 }
 0x103   :  { %v94_v47 = vmul.f32 %v260_v37, %v93_v45  ;;  %v78_v48 = vmul.f32 %v262_v46, %v67_v38  ;;  %v253_v37 = vld [vmem:[%s401_s4] ss:$0 sm:$0xff] }
 0x105   :  { %v95_v49 = vmul.f32 %v94_v47, %v68_v34  ;;  %v79_v50 = vmul.f32 %v262_v46, %v78_v48 }
 0x107   :  { %v80_v52 = vmul.f32 0.5, %v79_v50  ;;  %v97_v53 = vsel %vm96_vm3, %v68_v34, %v95_v49 }
 0x108   :  { %v100_v54 = vsel %vm98_vm4, %v99_v51, %v97_v53 }
 0x109   :  { %v81_v57 = vsub.f32 1.5, %v80_v52  ;;  %v102_v58 = vadd.f32 1e-06, %v100_v54 }
 0x10b   :  { %v82_v60 = vmul.f32 %v262_v46, %v81_v57  ;;  %263 = vrcp.f32 %v102_v58  ;;  %v129_v10 = vand.u32 2147483648, %v102_v58  ;;  %v127_v12 = vand.u32 2147483647, %v102_v58 }
 0x10c   :  { %vm123_vm8 = vweird.f32 %v102_v58 }
 0x10d   :  { %v83_v62 = vmul.f32 %v82_v60, %v67_v38  ;;  %v130_v15 = vor.u32 1.1754944e-38, %v129_v10  ;;  %vm128_vm10 = vcmp.eq.f32.partialorder %v127_v12, 8.507059e+37 }
 0x10f   :  { %v85_v2 = vsel %vm84_vm5, %v67_v38, %v83_v62 }
 0x110   :  { %v88_v3 = vsel %vm86_vm6, %v87_v63, %v85_v2 }
 0x111   :  { %v264_v5 = vpop.eup %263  ;;  %v101_v6 = vadd.f32 1e-06, %v88_v3 }
 0x112   :  { %v119_v7 = vmul.f32 %v264_v5, %v102_v58  ;;  %vm124_vm7 = vweird.f32 %v264_v5 }
 0x113   :  { %265 = vrcp.f32 %v101_v6  ;;  %vm125_vm9 = vmor %vm123_vm8, %vm124_vm7  ;;  %v114_v24 = vand.u32 2147483648, %v101_v6  ;;  %v112_v27 = vand.u32 2147483647, %v101_v6  ;;  %vm108_vm12 = vweird.f32 %v101_v6 }
 0x114   :  { %v120_v8 = vsub.f32 1.0, %v119_v7 }
 0x115   :  { %v115_v30 = vor.u32 1.1754944e-38, %v114_v24  ;;  %vm113_vm14 = vcmp.eq.f32.partialorder %v112_v27, 8.507059e+37 }
 0x116   :  { %v121_v11 = vmul.f32 %v264_v5, %v120_v8 }
 0x118   :  { %v122_v13 = vadd.f32 %v264_v5, %v121_v11 }
 0x119   :  { %v266_v14 = vpop.eup %265 }
 0x11a   :  { %v104_v17 = vmul.f32 %v266_v14, %v101_v6  ;;  %v126_v19 = vsel %vm125_vm9, %v264_v5, %v122_v13  ;;  %vm109_vm11 = vweird.f32 %v266_v14 }
 0x11b   :  { %v131_v20 = vsel %vm128_vm10, %v130_v15, %v126_v19  ;;  %vm110_vm13 = vmor %vm108_vm12, %vm109_vm11 }
 0x11c   :  { %v105_v21 = vsub.f32 1.0, %v104_v17  ;;  %v132_v22 = vmul.f32 %v131_v20, %v76_v16 }
 0x11e   :  { %v106_v26 = vmul.f32 %v266_v14, %v105_v21  ;;  %v140_v28 = vadd.f32 %v137_v25, %v132_v22 }
 0x120   :  { %v107_v29 = vadd.f32 %v266_v14, %v106_v26  ;;  %231 = vmatmul.msk.f32.vlgmr.msra.gmra.mxu3 %vm34_vm0, %v140_v28 }
 0x122   :  { %v111_v31 = vsel %vm110_vm13, %v266_v14, %v107_v29 }
 0x123   :  { %v116_v32 = vsel %vm113_vm14, %v115_v30, %v111_v31 }
 0x124   :  { %v117_v33 = vmul.f32 %v116_v32, %v75_v18 }
 0x126   :  { %v139_v34 = vadd.f32 %v137_v25, %v117_v33 }
 0x128   :  { %230 = vmatmul.msk.f32.vlgmr.msra.gmra.mxu0 %vm34_vm0, %v139_v34 }
 0x1a3   :  { %v175_v38 = vpop.f32.mrf.mxu3 }
 0x1a4   :  { %v176_v39 = vadd.f32 %v253_v37, %v175_v38 }
 0x1a5   :  { %v172_v40 = vpop.f32.mrf.mxu0 }
 0x1a6   :  { %v179_v41 = vmax.f32 %v176_v39, 0.0  ;;  %v173_v42 = vadd.f32 %v253_v37, %v172_v40 }
 0x1a8   :  { %v178_v43 = vmax.f32 %v173_v42, 0.0  ;;  %233 = vmatmul.msk.f32.vlgmr.msra.gmra.mxu2 %vm192_vm15, %v179_v41 }
 0x1aa   :  { %232 = vmatmul.msk.f32.vlgmr.msra.gmra.mxu1 %vm192_vm15, %v178_v43 }
 0x227   :  { %v216_v45 = vpop.f32.mrf.mxu1 }
 0x228   :  { %v217_v46 = vadd.f32 %v254_v44, %v216_v45 }
 0x22a   :  { %v222_v47 = vadd.f32 %v217_v46, %v323_v4 }
 0x22b   :  { %v219_v48 = vpop.f32.mrf.mxu2 }
 0x22c   :  { %224 = vst.msk [vmem:[%s405_s7] sm:$0xff] %vm34_vm0, %v222_v47  ;;  %v220_v49 = vadd.f32 %v254_v44, %v219_v48 }
 0x22e   :  { %v223_v50 = vadd.f32 %v220_v49, %v313_v0 }
 0x230   :  { %225 = vst.msk [vmem:[%s405_s7 + $0x8] sm:$0xff] %vm34_vm0, %v223_v50 }

</bundles_post_ra>
